<compile_context>
chip_gen: v7x
topology: tpu7x:2x2x1
jax: 0.10.0
libtpu: 0.0.40
codegen_flags: <defaults>
</compile_context>

<pallas_src>
import jax
import jax.numpy as jnp
from jax import lax
from jax.experimental import pallas as pl
from jax.experimental.pallas import tpu as pltpu


def lstm_kernel(x_ref, wih_ref, whh_hbm, b_ref, fcw_ref, fcb_ref, out_ref,
                whh_vmem, xp_ref, dma_sem):
    # Static shapes (Bp = batch padded to 8, Hp = hidden padded to 128,
    # Np = n_outputs padded to 128):
    #   x_ref    : (T*Bp, D)      f32   time-major, batch-padded input
    #   wih_ref  : (D,  4*Hp)     bf16  lane-stacked, lane-padded input weights
    #   whh_hbm  : (Hp, 4*Hp)     bf16  fused recurrent weights (manual DMA)
    #   b_ref    : (1,  4*Hp)     f32   fused bias (b_ih + b_hh), zero-padded
    #   fcw_ref  : (Hp, Np)       bf16  fc weight, zero-padded rows/cols
    #   fcb_ref  : (1,  Np)       f32
    #   out_ref  : (Bp, Np)       f32   lane-dense output slab
    #   whh_vmem : (Hp, 4*Hp)     bf16  VMEM landing buffer for whh
    #   xp_ref   : (T, Bp, 4*Hp)  f32   hoisted input projection
    T, Bp, four_Hp = xp_ref.shape
    Hp = four_Hp // 4

    # Kick off the largest DMA (whh) immediately; it overlaps the hoisted
    # input-projection matmul below.
    whh_copy = pltpu.make_async_copy(whh_hbm, whh_vmem, dma_sem)
    whh_copy.start()

    # Hoisted input projection: ONE bf16 MXU pass covers every timestep and
    # every gate (instead of 4*T tiny matmuls on the recurrence path).
    x_bf = x_ref[...].astype(jnp.bfloat16)                          # (T*Bp, D)
    xp = jnp.dot(x_bf, wih_ref[...],
                 preferred_element_type=jnp.float32) + b_ref[...]   # (T*Bp,4Hp)
    # Bp is a multiple of 8, so this reshape stays on (8,128) tile boundaries
    # and every xp_ref[t] slice in the loop is sublane-aligned.
    xp_ref[...] = xp.reshape(T, Bp, four_Hp)

    whh_copy.wait()

    def sigmoid_eup(v):
        # sigmoid(x) = 0.5*tanh(0.5*x) + 0.5 : keeps the nonlinearity on the
        # EUP slot, no dependent VALU divide on the serial chain.
        return 0.5 * jnp.tanh(0.5 * v) + 0.5

    def step(t, carry):
        # Zero-padding invariant: padded hidden lanes of `pre` are exactly 0
        # (weights/bias zero-padded), so g_pad = tanh(0) = 0 and c_pad/h_pad
        # stay identically 0 every step.  Do NOT add a nonzero initial state
        # or extra (e.g. forget-gate) bias without revisiting this.
        h, c = carry
        pre = xp_ref[t] + jnp.dot(h.astype(jnp.bfloat16), whh_vmem[...],
                                  preferred_element_type=jnp.float32)
        # Gate slices at 128-lane boundaries (PyTorch order i, f, g, o).
        i_g = sigmoid_eup(pre[:, 0 * Hp:1 * Hp])
        f_g = sigmoid_eup(pre[:, 1 * Hp:2 * Hp])
        g_g = jnp.tanh(pre[:, 2 * Hp:3 * Hp])
        o_g = sigmoid_eup(pre[:, 3 * Hp:4 * Hp])
        c = f_g * c + i_g * g_g
        h = o_g * jnp.tanh(c)
        return h, c

    h0 = jnp.zeros((Bp, Hp), jnp.float32)
    c0 = jnp.zeros((Bp, Hp), jnp.float32)
    # Short fixed trip-count -> unrolled for LLO scheduler visibility; h/c are
    # loop-carried vregs, x_proj stays in VMEM scratch.
    h, _ = lax.fori_loop(0, T, step, (h0, c0), unroll=True)

    # fc on the last hidden state.  Padded h lanes are exactly zero, so the
    # zero-padded fc rows contribute nothing; output is a lane-dense slab.
    out_ref[...] = (jnp.dot(h.astype(jnp.bfloat16), fcw_ref[...],
                            preferred_element_type=jnp.float32)
                    + fcb_ref[...])


def _round_up(v, m):
    return ((v + m - 1) // m) * m


def server_lstm_forward(x, wih, whh, bias, fcw, fcb):
    """x: (B, T, D) f32; wih: (4, D, H); whh: (4, H, H); bias: (4, 1, H)
    (already b_ih + b_hh); fcw: (H, n_out); fcb: (1, n_out).
    Gate order is PyTorch's (i, f, g, o).  Returns (B, n_out) f32."""
    B, T, D = x.shape
    H = whh.shape[-1]
    n_out = fcw.shape[-1]

    Hp = _round_up(H, 128)       # lane-align each gate's width
    Np = _round_up(n_out, 128)   # lane-dense output slab
    Bp = _round_up(B, 8)         # sublane-align the per-step batch block
    ph, pn, pb = Hp - H, Np - n_out, Bp - B

    # Fused, lane-padded parameter layouts.  Zero padding keeps padded hidden
    # lanes identically zero through the whole recurrence.  Matmul operands
    # are stored bf16 (single MXU pass; also halves the whh DMA); accumulation
    # stays f32 inside the kernel.
    wih_f = jnp.concatenate(
        [jnp.pad(wih[g], ((0, 0), (0, ph))) for g in range(4)],
        axis=-1).astype(jnp.bfloat16)                              # (D, 4*Hp)
    whh_f = jnp.concatenate(
        [jnp.pad(whh[g], ((0, ph), (0, ph))) for g in range(4)],
        axis=-1).astype(jnp.bfloat16)                              # (Hp, 4*Hp)
    b_f = jnp.concatenate(
        [jnp.pad(bias[g], ((0, 0), (0, ph))) for g in range(4)],
        axis=-1).astype(jnp.float32)                               # (1, 4*Hp)
    fcw_p = jnp.pad(fcw, ((0, ph), (0, pn))).astype(jnp.bfloat16)  # (Hp, Np)
    fcb_p = jnp.pad(fcb, ((0, 0), (0, pn))).astype(jnp.float32)    # (1, Np)

    # Time-major, batch padded to 8 sublanes, flattened so timestep t is an
    # aligned (Bp, D) row block.
    x_tm = jnp.pad(jnp.swapaxes(x, 0, 1), ((0, 0), (0, pb), (0, 0)))
    x_tm = x_tm.reshape(T * Bp, D).astype(jnp.float32)

    vmem = pl.BlockSpec(memory_space=pltpu.MemorySpace.VMEM)
    out = pl.pallas_call(
        lstm_kernel,
        out_shape=jax.ShapeDtypeStruct((Bp, Np), jnp.float32),
        in_specs=[vmem, vmem,
                  pl.BlockSpec(memory_space=pl.ANY),     # whh: manual DMA
                  vmem, vmem, vmem],
        out_specs=vmem,
        scratch_shapes=[
            pltpu.VMEM((Hp, 4 * Hp), jnp.bfloat16),      # whh landing buffer
            pltpu.VMEM((T, Bp, 4 * Hp), jnp.float32),    # hoisted x projection
            pltpu.SemaphoreType.DMA,
        ],
    )(x_tm, wih_f, whh_f, b_f, fcw_p, fcb_p)
    return out[:B, :n_out]


def reference_forward(x, wih, whh, bias, fcw, fcb):
    """Pure-JAX f32 reference matching PyTorch LSTM semantics."""
    B, T, D = x.shape
    H = whh.shape[-1]

    def step(carry, x_t):
        h, c = carry

        def gate(k):
            return x_t @ wih[k] + h @ whh[k] + bias[k]

        i = jax.nn.sigmoid(gate(0))
        f = jax.nn.sigmoid(gate(1))
        g = jnp.tanh(gate(2))
        o = jax.nn.sigmoid(gate(3))
        c = f * c + i * g
        h = o * jnp.tanh(c)
        return (h, c), None

    h0 = jnp.zeros((B, H), jnp.float32)
    c0 = jnp.zeros((B, H), jnp.float32)
    (h_last, _), _ = lax.scan(step, (h0, c0), jnp.swapaxes(x, 0, 1))
    return h_last @ fcw + fcb


if __name__ == "__main__":
    B, T, D = 2, 8, 16        # batch, seq, input_shape
    H = 50                    # LSTM hidden size (fixed by the module)
    N_OUT = 8                 # n_outputs

    key = jax.random.PRNGKey(0)
    ks = jax.random.split(key, 7)
    bound = 1.0 / jnp.sqrt(jnp.float32(H))   # PyTorch default init range

    x = jax.random.normal(ks[0], (B, T, D), dtype=jnp.float32)

    # PyTorch stores weight_ih_l0 (4H, D), weight_hh_l0 (4H, H); we build the
    # transposed per-gate layout directly: (4, D, H) and (4, H, H).
    wih = jax.random.uniform(ks[1], (4, D, H), jnp.float32, -bound, bound)
    whh = jax.random.uniform(ks[2], (4, H, H), jnp.float32, -bound, bound)
    b_ih = jax.random.uniform(ks[3], (4, 1, H), jnp.float32, -bound, bound)
    b_hh = jax.random.uniform(ks[4], (4, 1, H), jnp.float32, -bound, bound)
    bias = b_ih + b_hh                        # PyTorch adds both bias vectors

    fcw = jax.random.uniform(ks[5], (H, N_OUT), jnp.float32, -bound, bound)
    fcb = jax.random.uniform(ks[6], (1, N_OUT), jnp.float32, -bound, bound)

    out = server_lstm_forward(x, wih, whh, bias, fcw, fcb)
    out = jax.block_until_ready(out)

    ref = reference_forward(x, wih, whh, bias, fcw, fcb)
    assert out.shape == (B, N_OUT)
    # bf16 matmul operands (f32 accumulation) over an 8-step recurrence:
    # tolerance widened accordingly vs. the pure-f32 reference.
    assert jnp.allclose(out, ref, rtol=2e-2, atol=2e-2), (out, ref)

    print("KERNEL_OK")
</pallas_src>

<mosaic_0001>
module attributes {stable_mosaic.version = 11 : i64} {
  func.func @lstm_kernel(%arg0: memref<64x16xf32, #tpu.memory_space<vmem>>, %arg1: memref<16x512xbf16, #tpu.memory_space<vmem>>, %arg2: memref<128x512xbf16, #tpu.memory_space<any>>, %arg3: memref<1x512xf32, #tpu.memory_space<vmem>>, %arg4: memref<128x128xbf16, #tpu.memory_space<vmem>>, %arg5: memref<1x128xf32, #tpu.memory_space<vmem>>, %arg6: memref<8x128xf32, #tpu.memory_space<vmem>>, %arg7: memref<128x512xbf16, #tpu.memory_space<vmem>>, %arg8: memref<8x8x512xf32, #tpu.memory_space<vmem>>, %arg9: memref<!tpu.dma_semaphore, #tpu.memory_space<semaphore_mem>>) attributes {dimension_semantics = [], scalar_prefetch = 0 : i64, scratch_operands = 3 : i64, tpu.core_type = #tpu.core_type<tc>} {
    tpu.enqueue_dma source(%arg2 : memref<128x512xbf16, #tpu.memory_space<any>>) target(%arg7 : memref<128x512xbf16, #tpu.memory_space<vmem>>) target_semaphore(%arg9 : memref<!tpu.dma_semaphore, #tpu.memory_space<semaphore_mem>>)
    %c0 = arith.constant 0 : index
    %c0_0 = arith.constant 0 : index
    %0 = vector.load %arg0[%c0, %c0_0] : memref<64x16xf32, #tpu.memory_space<vmem>>, vector<64x16xf32>
    %1 = arith.truncf %0 : vector<64x16xf32> to vector<64x16xbf16>
    %c0_1 = arith.constant 0 : index
    %c0_2 = arith.constant 0 : index
    %2 = vector.load %arg1[%c0_1, %c0_2] : memref<16x512xbf16, #tpu.memory_space<vmem>>, vector<16x512xbf16>
    %cst = arith.constant dense<0.000000e+00> : vector<64x512xf32>
    %3 = tpu.matmul %1, %2, %cst {dimension_numbers = #tpu.dot_dimension_numbers<[1], [0], [0], [1], [0, 0, 1, 1], [], []>} : vector<64x16xbf16>, vector<16x512xbf16>, vector<64x512xf32> -> vector<64x512xf32>
    %c0_3 = arith.constant 0 : index
    %c0_4 = arith.constant 0 : index
    %4 = vector.load %arg3[%c0_3, %c0_4] : memref<1x512xf32, #tpu.memory_space<vmem>>, vector<1x512xf32>
    %5 = vector.broadcast %4 : vector<1x512xf32> to vector<64x512xf32>
    %6 = arith.addf %3, %5 : vector<64x512xf32>
    %7 = vector.shape_cast %6 : vector<64x512xf32> to vector<8x8x512xf32>
    %c0_5 = arith.constant 0 : index
    %c0_6 = arith.constant 0 : index
    %c0_7 = arith.constant 0 : index
    %8 = vector.load %arg8[%c0_5, %c0_6, %c0_7] : memref<8x8x512xf32, #tpu.memory_space<vmem>>, vector<8x8x512xf32>
    tpu.vector_store %arg8[%c0_5, %c0_6, %c0_7], %7 {strides = array<i32>} : memref<8x8x512xf32, #tpu.memory_space<vmem>>, vector<8x8x512xf32>,
    tpu.wait_dma2 semaphore(%arg9 : memref<!tpu.dma_semaphore, #tpu.memory_space<semaphore_mem>>) src(%arg2 : memref<128x512xbf16, #tpu.memory_space<any>>) dst(%arg7 : memref<128x512xbf16, #tpu.memory_space<vmem>>)
    %cst_8 = arith.constant 0.000000e+00 : f32
    %9 = vector.broadcast %cst_8 : f32 to vector<8x128xf32>
    %cst_9 = arith.constant 0.000000e+00 : f32
    %10 = vector.broadcast %cst_9 : f32 to vector<8x128xf32>
    %c0_i32 = arith.constant 0 : i32
    %11 = arith.index_cast %c0_i32 : i32 to index
    %c0_10 = arith.constant 0 : index
    %c0_11 = arith.constant 0 : index
    %12 = vector.load %arg8[%11, %c0_10, %c0_11] : memref<8x8x512xf32, #tpu.memory_space<vmem>>, vector<1x8x512xf32>
    %13 = vector.shape_cast %12 : vector<1x8x512xf32> to vector<8x512xf32>
    %14 = arith.truncf %9 : vector<8x128xf32> to vector<8x128xbf16>
    %c0_12 = arith.constant 0 : index
    %c0_13 = arith.constant 0 : index
    %15 = vector.load %arg7[%c0_12, %c0_13] : memref<128x512xbf16, #tpu.memory_space<vmem>>, vector<128x512xbf16>
    %cst_14 = arith.constant dense<0.000000e+00> : vector<8x512xf32>
    %16 = tpu.matmul %14, %15, %cst_14 {dimension_numbers = #tpu.dot_dimension_numbers<[1], [0], [0], [1], [0, 0, 1, 1], [], []>} : vector<8x128xbf16>, vector<128x512xbf16>, vector<8x512xf32> -> vector<8x512xf32>
    %17 = arith.addf %13, %16 : vector<8x512xf32>
    %18 = vector.extract_strided_slice %17 {offsets = [0, 0], sizes = [8, 128], strides = [1, 1]} : vector<8x512xf32> to vector<8x128xf32>
    %cst_15 = arith.constant 5.000000e-01 : f32
    %19 = vector.broadcast %cst_15 : f32 to vector<8x128xf32>
    %20 = arith.mulf %19, %18 : vector<8x128xf32>
    %21 = math.tanh %20 : vector<8x128xf32>
    %cst_16 = arith.constant 5.000000e-01 : f32
    %22 = vector.broadcast %cst_16 : f32 to vector<8x128xf32>
    %23 = arith.mulf %22, %21 : vector<8x128xf32>
    %cst_17 = arith.constant 5.000000e-01 : f32
    %24 = vector.broadcast %cst_17 : f32 to vector<8x128xf32>
    %25 = arith.addf %23, %24 : vector<8x128xf32>
    %26 = vector.extract_strided_slice %17 {offsets = [0, 128], sizes = [8, 128], strides = [1, 1]} : vector<8x512xf32> to vector<8x128xf32>
    %cst_18 = arith.constant 5.000000e-01 : f32
    %27 = vector.broadcast %cst_18 : f32 to vector<8x128xf32>
    %28 = arith.mulf %27, %26 : vector<8x128xf32>
    %29 = math.tanh %28 : vector<8x128xf32>
    %cst_19 = arith.constant 5.000000e-01 : f32
    %30 = vector.broadcast %cst_19 : f32 to vector<8x128xf32>
    %31 = arith.mulf %30, %29 : vector<8x128xf32>
    %cst_20 = arith.constant 5.000000e-01 : f32
    %32 = vector.broadcast %cst_20 : f32 to vector<8x128xf32>
    %33 = arith.addf %31, %32 : vector<8x128xf32>
    %34 = vector.extract_strided_slice %17 {offsets = [0, 256], sizes = [8, 128], strides = [1, 1]} : vector<8x512xf32> to vector<8x128xf32>
    %35 = math.tanh %34 : vector<8x128xf32>
    %36 = vector.extract_strided_slice %17 {offsets = [0, 384], sizes = [8, 128], strides = [1, 1]} : vector<8x512xf32> to vector<8x128xf32>
    %cst_21 = arith.constant 5.000000e-01 : f32
    %37 = vector.broadcast %cst_21 : f32 to vector<8x128xf32>
    %38 = arith.mulf %37, %36 : vector<8x128xf32>
    %39 = math.tanh %38 : vector<8x128xf32>
    %cst_22 = arith.constant 5.000000e-01 : f32
    %40 = vector.broadcast %cst_22 : f32 to vector<8x128xf32>
    %41 = arith.mulf %40, %39 : vector<8x128xf32>
    %cst_23 = arith.constant 5.000000e-01 : f32
    %42 = vector.broadcast %cst_23 : f32 to vector<8x128xf32>
    %43 = arith.addf %41, %42 : vector<8x128xf32>
    %44 = arith.mulf %33, %10 : vector<8x128xf32>
    %45 = arith.mulf %25, %35 : vector<8x128xf32>
    %46 = arith.addf %44, %45 : vector<8x128xf32>
    %47 = math.tanh %46 : vector<8x128xf32>
    %48 = arith.mulf %43, %47 : vector<8x128xf32>
    %c1_i32 = arith.constant 1 : i32
    %49 = arith.index_cast %c1_i32 : i32 to index
    %c0_24 = arith.constant 0 : index
    %c0_25 = arith.constant 0 : index
    %50 = vector.load %arg8[%49, %c0_24, %c0_25] : memref<8x8x512xf32, #tpu.memory_space<vmem>>, vector<1x8x512xf32>
    %51 = vector.shape_cast %50 : vector<1x8x512xf32> to vector<8x512xf32>
    %52 = arith.truncf %48 : vector<8x128xf32> to vector<8x128xbf16>
    %c0_26 = arith.constant 0 : index
    %c0_27 = arith.constant 0 : index
    %53 = vector.load %arg7[%c0_26, %c0_27] : memref<128x512xbf16, #tpu.memory_space<vmem>>, vector<128x512xbf16>
    %cst_28 = arith.constant dense<0.000000e+00> : vector<8x512xf32>
    %54 = tpu.matmul %52, %53, %cst_28 {dimension_numbers = #tpu.dot_dimension_numbers<[1], [0], [0], [1], [0, 0, 1, 1], [], []>} : vector<8x128xbf16>, vector<128x512xbf16>, vector<8x512xf32> -> vector<8x512xf32>
    %55 = arith.addf %51, %54 : vector<8x512xf32>
    %56 = vector.extract_strided_slice %55 {offsets = [0, 0], sizes = [8, 128], strides = [1, 1]} : vector<8x512xf32> to vector<8x128xf32>
    %cst_29 = arith.constant 5.000000e-01 : f32
    %57 = vector.broadcast %cst_29 : f32 to vector<8x128xf32>
    %58 = arith.mulf %57, %56 : vector<8x128xf32>
    %59 = math.tanh %58 : vector<8x128xf32>
    %cst_30 = arith.constant 5.000000e-01 : f32
    %60 = vector.broadcast %cst_30 : f32 to vector<8x128xf32>
    %61 = arith.mulf %60, %59 : vector<8x128xf32>
    %cst_31 = arith.constant 5.000000e-01 : f32
    %62 = vector.broadcast %cst_31 : f32 to vector<8x128xf32>
    %63 = arith.addf %61, %62 : vector<8x128xf32>
    %64 = vector.extract_strided_slice %55 {offsets = [0, 128], sizes = [8, 128], strides = [1, 1]} : vector<8x512xf32> to vector<8x128xf32>
    %cst_32 = arith.constant 5.000000e-01 : f32
    %65 = vector.broadcast %cst_32 : f32 to vector<8x128xf32>
    %66 = arith.mulf %65, %64 : vector<8x128xf32>
    %67 = math.tanh %66 : vector<8x128xf32>
    %cst_33 = arith.constant 5.000000e-01 : f32
    %68 = vector.broadcast %cst_33 : f32 to vector<8x128xf32>
    %69 = arith.mulf %68, %67 : vector<8x128xf32>
    %cst_34 = arith.constant 5.000000e-01 : f32
    %70 = vector.broadcast %cst_34 : f32 to vector<8x128xf32>
    %71 = arith.addf %69, %70 : vector<8x128xf32>
    %72 = vector.extract_strided_slice %55 {offsets = [0, 256], sizes = [8, 128], strides = [1, 1]} : vector<8x512xf32> to vector<8x128xf32>
    %73 = math.tanh %72 : vector<8x128xf32>
    %74 = vector.extract_strided_slice %55 {offsets = [0, 384], sizes = [8, 128], strides = [1, 1]} : vector<8x512xf32> to vector<8x128xf32>
    %cst_35 = arith.constant 5.000000e-01 : f32
    %75 = vector.broadcast %cst_35 : f32 to vector<8x128xf32>
    %76 = arith.mulf %75, %74 : vector<8x128xf32>
    %77 = math.tanh %76 : vector<8x128xf32>
    %cst_36 = arith.constant 5.000000e-01 : f32
    %78 = vector.broadcast %cst_36 : f32 to vector<8x128xf32>
    %79 = arith.mulf %78, %77 : vector<8x128xf32>
    %cst_37 = arith.constant 5.000000e-01 : f32
    %80 = vector.broadcast %cst_37 : f32 to vector<8x128xf32>
    %81 = arith.addf %79, %80 : vector<8x128xf32>
    %82 = arith.mulf %71, %46 : vector<8x128xf32>
    %83 = arith.mulf %63, %73 : vector<8x128xf32>
    %84 = arith.addf %82, %83 : vector<8x128xf32>
    %85 = math.tanh %84 : vector<8x128xf32>
    %86 = arith.mulf %81, %85 : vector<8x128xf32>
    %c2_i32 = arith.constant 2 : i32
    %87 = arith.index_cast %c2_i32 : i32 to index
    %c0_38 = arith.constant 0 : index
    %c0_39 = arith.constant 0 : index
    %88 = vector.load %arg8[%87, %c0_38, %c0_39] : memref<8x8x512xf32, #tpu.memory_space<vmem>>, vector<1x8x512xf32>
    %89 = vector.shape_cast %88 : vector<1x8x512xf32> to vector<8x512xf32>
    %90 = arith.truncf %86 : vector<8x128xf32> to vector<8x128xbf16>
    %c0_40 = arith.constant 0 : index
    %c0_41 = arith.constant 0 : index
    %91 = vector.load %arg7[%c0_40, %c0_41] : memref<128x512xbf16, #tpu.memory_space<vmem>>, vector<128x512xbf16>
    %cst_42 = arith.constant dense<0.000000e+00> : vector<8x512xf32>
    %92 = tpu.matmul %90, %91, %cst_42 {dimension_numbers = #tpu.dot_dimension_numbers<[1], [0], [0], [1], [0, 0, 1, 1], [], []>} : vector<8x128xbf16>, vector<128x512xbf16>, vector<8x512xf32> -> vector<8x512xf32>
    %93 = arith.addf %89, %92 : vector<8x512xf32>
    %94 = vector.extract_strided_slice %93 {offsets = [0, 0], sizes = [8, 128], strides = [1, 1]} : vector<8x512xf32> to vector<8x128xf32>
    %cst_43 = arith.constant 5.000000e-01 : f32
    %95 = vector.broadcast %cst_43 : f32 to vector<8x128xf32>
    %96 = arith.mulf %95, %94 : vector<8x128xf32>
    %97 = math.tanh %96 : vector<8x128xf32>
    %cst_44 = arith.constant 5.000000e-01 : f32
    %98 = vector.broadcast %cst_44 : f32 to vector<8x128xf32>
    %99 = arith.mulf %98, %97 : vector<8x128xf32>
    %cst_45 = arith.constant 5.000000e-01 : f32
    %100 = vector.broadcast %cst_45 : f32 to vector<8x128xf32>
    %101 = arith.addf %99, %100 : vector<8x128xf32>
    %102 = vector.extract_strided_slice %93 {offsets = [0, 128], sizes = [8, 128], strides = [1, 1]} : vector<8x512xf32> to vector<8x128xf32>
    %cst_46 = arith.constant 5.000000e-01 : f32
    %103 = vector.broadcast %cst_46 : f32 to vector<8x128xf32>
    %104 = arith.mulf %103, %102 : vector<8x128xf32>
    %105 = math.tanh %104 : vector<8x128xf32>
    %cst_47 = arith.constant 5.000000e-01 : f32
    %106 = vector.broadcast %cst_47 : f32 to vector<8x128xf32>
    %107 = arith.mulf %106, %105 : vector<8x128xf32>
    %cst_48 = arith.constant 5.000000e-01 : f32
    %108 = vector.broadcast %cst_48 : f32 to vector<8x128xf32>
    %109 = arith.addf %107, %108 : vector<8x128xf32>
    %110 = vector.extract_strided_slice %93 {offsets = [0, 256], sizes = [8, 128], strides = [1, 1]} : vector<8x512xf32> to vector<8x128xf32>
    %111 = math.tanh %110 : vector<8x128xf32>
    %112 = vector.extract_strided_slice %93 {offsets = [0, 384], sizes = [8, 128], strides = [1, 1]} : vector<8x512xf32> to vector<8x128xf32>
    %cst_49 = arith.constant 5.000000e-01 : f32
    %113 = vector.broadcast %cst_49 : f32 to vector<8x128xf32>
    %114 = arith.mulf %113, %112 : vector<8x128xf32>
    %115 = math.tanh %114 : vector<8x128xf32>
    %cst_50 = arith.constant 5.000000e-01 : f32
    %116 = vector.broadcast %cst_50 : f32 to vector<8x128xf32>
    %117 = arith.mulf %116, %115 : vector<8x128xf32>
    %cst_51 = arith.constant 5.000000e-01 : f32
    %118 = vector.broadcast %cst_51 : f32 to vector<8x128xf32>
    %119 = arith.addf %117, %118 : vector<8x128xf32>
    %120 = arith.mulf %109, %84 : vector<8x128xf32>
    %121 = arith.mulf %101, %111 : vector<8x128xf32>
    %122 = arith.addf %120, %121 : vector<8x128xf32>
    %123 = math.tanh %122 : vector<8x128xf32>
    %124 = arith.mulf %119, %123 : vector<8x128xf32>
    %c3_i32 = arith.constant 3 : i32
    %125 = arith.index_cast %c3_i32 : i32 to index
    %c0_52 = arith.constant 0 : index
    %c0_53 = arith.constant 0 : index
    %126 = vector.load %arg8[%125, %c0_52, %c0_53] : memref<8x8x512xf32, #tpu.memory_space<vmem>>, vector<1x8x512xf32>
    %127 = vector.shape_cast %126 : vector<1x8x512xf32> to vector<8x512xf32>
    %128 = arith.truncf %124 : vector<8x128xf32> to vector<8x128xbf16>
    %c0_54 = arith.constant 0 : index
    %c0_55 = arith.constant 0 : index
    %129 = vector.load %arg7[%c0_54, %c0_55] : memref<128x512xbf16, #tpu.memory_space<vmem>>, vector<128x512xbf16>
    %cst_56 = arith.constant dense<0.000000e+00> : vector<8x512xf32>
    %130 = tpu.matmul %128, %129, %cst_56 {dimension_numbers = #tpu.dot_dimension_numbers<[1], [0], [0], [1], [0, 0, 1, 1], [], []>} : vector<8x128xbf16>, vector<128x512xbf16>, vector<8x512xf32> -> vector<8x512xf32>
    %131 = arith.addf %127, %130 : vector<8x512xf32>
    %132 = vector.extract_strided_slice %131 {offsets = [0, 0], sizes = [8, 128], strides = [1, 1]} : vector<8x512xf32> to vector<8x128xf32>
    %cst_57 = arith.constant 5.000000e-01 : f32
    %133 = vector.broadcast %cst_57 : f32 to vector<8x128xf32>
    %134 = arith.mulf %133, %132 : vector<8x128xf32>
    %135 = math.tanh %134 : vector<8x128xf32>
    %cst_58 = arith.constant 5.000000e-01 : f32
    %136 = vector.broadcast %cst_58 : f32 to vector<8x128xf32>
    %137 = arith.mulf %136, %135 : vector<8x128xf32>
    %cst_59 = arith.constant 5.000000e-01 : f32
    %138 = vector.broadcast %cst_59 : f32 to vector<8x128xf32>
    %139 = arith.addf %137, %138 : vector<8x128xf32>
    %140 = vector.extract_strided_slice %131 {offsets = [0, 128], sizes = [8, 128], strides = [1, 1]} : vector<8x512xf32> to vector<8x128xf32>
    %cst_60 = arith.constant 5.000000e-01 : f32
    %141 = vector.broadcast %cst_60 : f32 to vector<8x128xf32>
    %142 = arith.mulf %141, %140 : vector<8x128xf32>
    %143 = math.tanh %142 : vector<8x128xf32>
    %cst_61 = arith.constant 5.000000e-01 : f32
    %144 = vector.broadcast %cst_61 : f32 to vector<8x128xf32>
    %145 = arith.mulf %144, %143 : vector<8x128xf32>
    %cst_62 = arith.constant 5.000000e-01 : f32
    %146 = vector.broadcast %cst_62 : f32 to vector<8x128xf32>
    %147 = arith.addf %145, %146 : vector<8x128xf32>
    %148 = vector.extract_strided_slice %131 {offsets = [0, 256], sizes = [8, 128], strides = [1, 1]} : vector<8x512xf32> to vector<8x128xf32>
    %149 = math.tanh %148 : vector<8x128xf32>
    %150 = vector.extract_strided_slice %131 {offsets = [0, 384], sizes = [8, 128], strides = [1, 1]} : vector<8x512xf32> to vector<8x128xf32>
    %cst_63 = arith.constant 5.000000e-01 : f32
    %151 = vector.broadcast %cst_63 : f32 to vector<8x128xf32>
    %152 = arith.mulf %151, %150 : vector<8x128xf32>
    %153 = math.tanh %152 : vector<8x128xf32>
    %cst_64 = arith.constant 5.000000e-01 : f32
    %154 = vector.broadcast %cst_64 : f32 to vector<8x128xf32>
    %155 = arith.mulf %154, %153 : vector<8x128xf32>
    %cst_65 = arith.constant 5.000000e-01 : f32
    %156 = vector.broadcast %cst_65 : f32 to vector<8x128xf32>
    %157 = arith.addf %155, %156 : vector<8x128xf32>
    %158 = arith.mulf %147, %122 : vector<8x128xf32>
    %159 = arith.mulf %139, %149 : vector<8x128xf32>
    %160 = arith.addf %158, %159 : vector<8x128xf32>
    %161 = math.tanh %160 : vector<8x128xf32>
    %162 = arith.mulf %157, %161 : vector<8x128xf32>
    %c4_i32 = arith.constant 4 : i32
    %163 = arith.index_cast %c4_i32 : i32 to index
    %c0_66 = arith.constant 0 : index
    %c0_67 = arith.constant 0 : index
    %164 = vector.load %arg8[%163, %c0_66, %c0_67] : memref<8x8x512xf32, #tpu.memory_space<vmem>>, vector<1x8x512xf32>
    %165 = vector.shape_cast %164 : vector<1x8x512xf32> to vector<8x512xf32>
    %166 = arith.truncf %162 : vector<8x128xf32> to vector<8x128xbf16>
    %c0_68 = arith.constant 0 : index
    %c0_69 = arith.constant 0 : index
    %167 = vector.load %arg7[%c0_68, %c0_69] : memref<128x512xbf16, #tpu.memory_space<vmem>>, vector<128x512xbf16>
    %cst_70 = arith.constant dense<0.000000e+00> : vector<8x512xf32>
    %168 = tpu.matmul %166, %167, %cst_70 {dimension_numbers = #tpu.dot_dimension_numbers<[1], [0], [0], [1], [0, 0, 1, 1], [], []>} : vector<8x128xbf16>, vector<128x512xbf16>, vector<8x512xf32> -> vector<8x512xf32>
    %169 = arith.addf %165, %168 : vector<8x512xf32>
    %170 = vector.extract_strided_slice %169 {offsets = [0, 0], sizes = [8, 128], strides = [1, 1]} : vector<8x512xf32> to vector<8x128xf32>
    %cst_71 = arith.constant 5.000000e-01 : f32
    %171 = vector.broadcast %cst_71 : f32 to vector<8x128xf32>
    %172 = arith.mulf %171, %170 : vector<8x128xf32>
    %173 = math.tanh %172 : vector<8x128xf32>
    %cst_72 = arith.constant 5.000000e-01 : f32
    %174 = vector.broadcast %cst_72 : f32 to vector<8x128xf32>
    %175 = arith.mulf %174, %173 : vector<8x128xf32>
    %cst_73 = arith.constant 5.000000e-01 : f32
    %176 = vector.broadcast %cst_73 : f32 to vector<8x128xf32>
    %177 = arith.addf %175, %176 : vector<8x128xf32>
    %178 = vector.extract_strided_slice %169 {offsets = [0, 128], sizes = [8, 128], strides = [1, 1]} : vector<8x512xf32> to vector<8x128xf32>
    %cst_74 = arith.constant 5.000000e-01 : f32
    %179 = vector.broadcast %cst_74 : f32 to vector<8x128xf32>
    %180 = arith.mulf %179, %178 : vector<8x128xf32>
    %181 = math.tanh %180 : vector<8x128xf32>
    %cst_75 = arith.constant 5.000000e-01 : f32
    %182 = vector.broadcast %cst_75 : f32 to vector<8x128xf32>
    %183 = arith.mulf %182, %181 : vector<8x128xf32>
    %cst_76 = arith.constant 5.000000e-01 : f32
    %184 = vector.broadcast %cst_76 : f32 to vector<8x128xf32>
    %185 = arith.addf %183, %184 : vector<8x128xf32>
    %186 = vector.extract_strided_slice %169 {offsets = [0, 256], sizes = [8, 128], strides = [1, 1]} : vector<8x512xf32> to vector<8x128xf32>
    %187 = math.tanh %186 : vector<8x128xf32>
    %188 = vector.extract_strided_slice %169 {offsets = [0, 384], sizes = [8, 128], strides = [1, 1]} : vector<8x512xf32> to vector<8x128xf32>
    %cst_77 = arith.constant 5.000000e-01 : f32
    %189 = vector.broadcast %cst_77 : f32 to vector<8x128xf32>
    %190 = arith.mulf %189, %188 : vector<8x128xf32>
    %191 = math.tanh %190 : vector<8x128xf32>
    %cst_78 = arith.constant 5.000000e-01 : f32
    %192 = vector.broadcast %cst_78 : f32 to vector<8x128xf32>
    %193 = arith.mulf %192, %191 : vector<8x128xf32>
    %cst_79 = arith.constant 5.000000e-01 : f32
    %194 = vector.broadcast %cst_79 : f32 to vector<8x128xf32>
    %195 = arith.addf %193, %194 : vector<8x128xf32>
    %196 = arith.mulf %185, %160 : vector<8x128xf32>
    %197 = arith.mulf %177, %187 : vector<8x128xf32>
    %198 = arith.addf %196, %197 : vector<8x128xf32>
    %199 = math.tanh %198 : vector<8x128xf32>
    %200 = arith.mulf %195, %199 : vector<8x128xf32>
    %c5_i32 = arith.constant 5 : i32
    %201 = arith.index_cast %c5_i32 : i32 to index
    %c0_80 = arith.constant 0 : index
    %c0_81 = arith.constant 0 : index
    %202 = vector.load %arg8[%201, %c0_80, %c0_81] : memref<8x8x512xf32, #tpu.memory_space<vmem>>, vector<1x8x512xf32>
    %203 = vector.shape_cast %202 : vector<1x8x512xf32> to vector<8x512xf32>
    %204 = arith.truncf %200 : vector<8x128xf32> to vector<8x128xbf16>
    %c0_82 = arith.constant 0 : index
    %c0_83 = arith.constant 0 : index
    %205 = vector.load %arg7[%c0_82, %c0_83] : memref<128x512xbf16, #tpu.memory_space<vmem>>, vector<128x512xbf16>
    %cst_84 = arith.constant dense<0.000000e+00> : vector<8x512xf32>
    %206 = tpu.matmul %204, %205, %cst_84 {dimension_numbers = #tpu.dot_dimension_numbers<[1], [0], [0], [1], [0, 0, 1, 1], [], []>} : vector<8x128xbf16>, vector<128x512xbf16>, vector<8x512xf32> -> vector<8x512xf32>
    %207 = arith.addf %203, %206 : vector<8x512xf32>
    %208 = vector.extract_strided_slice %207 {offsets = [0, 0], sizes = [8, 128], strides = [1, 1]} : vector<8x512xf32> to vector<8x128xf32>
    %cst_85 = arith.constant 5.000000e-01 : f32
    %209 = vector.broadcast %cst_85 : f32 to vector<8x128xf32>
    %210 = arith.mulf %209, %208 : vector<8x128xf32>
    %211 = math.tanh %210 : vector<8x128xf32>
    %cst_86 = arith.constant 5.000000e-01 : f32
    %212 = vector.broadcast %cst_86 : f32 to vector<8x128xf32>
    %213 = arith.mulf %212, %211 : vector<8x128xf32>
    %cst_87 = arith.constant 5.000000e-01 : f32
    %214 = vector.broadcast %cst_87 : f32 to vector<8x128xf32>
    %215 = arith.addf %213, %214 : vector<8x128xf32>
    %216 = vector.extract_strided_slice %207 {offsets = [0, 128], sizes = [8, 128], strides = [1, 1]} : vector<8x512xf32> to vector<8x128xf32>
    %cst_88 = arith.constant 5.000000e-01 : f32
    %217 = vector.broadcast %cst_88 : f32 to vector<8x128xf32>
    %218 = arith.mulf %217, %216 : vector<8x128xf32>
    %219 = math.tanh %218 : vector<8x128xf32>
    %cst_89 = arith.constant 5.000000e-01 : f32
    %220 = vector.broadcast %cst_89 : f32 to vector<8x128xf32>
    %221 = arith.mulf %220, %219 : vector<8x128xf32>
    %cst_90 = arith.constant 5.000000e-01 : f32
    %222 = vector.broadcast %cst_90 : f32 to vector<8x128xf32>
    %223 = arith.addf %221, %222 : vector<8x128xf32>
    %224 = vector.extract_strided_slice %207 {offsets = [0, 256], sizes = [8, 128], strides = [1, 1]} : vector<8x512xf32> to vector<8x128xf32>
    %225 = math.tanh %224 : vector<8x128xf32>
    %226 = vector.extract_strided_slice %207 {offsets = [0, 384], sizes = [8, 128], strides = [1, 1]} : vector<8x512xf32> to vector<8x128xf32>
    %cst_91 = arith.constant 5.000000e-01 : f32
    %227 = vector.broadcast %cst_91 : f32 to vector<8x128xf32>
    %228 = arith.mulf %227, %226 : vector<8x128xf32>
    %229 = math.tanh %228 : vector<8x128xf32>
    %cst_92 = arith.constant 5.000000e-01 : f32
    %230 = vector.broadcast %cst_92 : f32 to vector<8x128xf32>
    %231 = arith.mulf %230, %229 : vector<8x128xf32>
    %cst_93 = arith.constant 5.000000e-01 : f32
    %232 = vector.broadcast %cst_93 : f32 to vector<8x128xf32>
    %233 = arith.addf %231, %232 : vector<8x128xf32>
    %234 = arith.mulf %223, %198 : vector<8x128xf32>
    %235 = arith.mulf %215, %225 : vector<8x128xf32>
    %236 = arith.addf %234, %235 : vector<8x128xf32>
    %237 = math.tanh %236 : vector<8x128xf32>
    %238 = arith.mulf %233, %237 : vector<8x128xf32>
    %c6_i32 = arith.constant 6 : i32
    %239 = arith.index_cast %c6_i32 : i32 to index
    %c0_94 = arith.constant 0 : index
    %c0_95 = arith.constant 0 : index
    %240 = vector.load %arg8[%239, %c0_94, %c0_95] : memref<8x8x512xf32, #tpu.memory_space<vmem>>, vector<1x8x512xf32>
    %241 = vector.shape_cast %240 : vector<1x8x512xf32> to vector<8x512xf32>
    %242 = arith.truncf %238 : vector<8x128xf32> to vector<8x128xbf16>
    %c0_96 = arith.constant 0 : index
    %c0_97 = arith.constant 0 : index
    %243 = vector.load %arg7[%c0_96, %c0_97] : memref<128x512xbf16, #tpu.memory_space<vmem>>, vector<128x512xbf16>
    %cst_98 = arith.constant dense<0.000000e+00> : vector<8x512xf32>
    %244 = tpu.matmul %242, %243, %cst_98 {dimension_numbers = #tpu.dot_dimension_numbers<[1], [0], [0], [1], [0, 0, 1, 1], [], []>} : vector<8x128xbf16>, vector<128x512xbf16>, vector<8x512xf32> -> vector<8x512xf32>
    %245 = arith.addf %241, %244 : vector<8x512xf32>
    %246 = vector.extract_strided_slice %245 {offsets = [0, 0], sizes = [8, 128], strides = [1, 1]} : vector<8x512xf32> to vector<8x128xf32>
    %cst_99 = arith.constant 5.000000e-01 : f32
    %247 = vector.broadcast %cst_99 : f32 to vector<8x128xf32>
    %248 = arith.mulf %247, %246 : vector<8x128xf32>
    %249 = math.tanh %248 : vector<8x128xf32>
    %cst_100 = arith.constant 5.000000e-01 : f32
    %250 = vector.broadcast %cst_100 : f32 to vector<8x128xf32>
    %251 = arith.mulf %250, %249 : vector<8x128xf32>
    %cst_101 = arith.constant 5.000000e-01 : f32
    %252 = vector.broadcast %cst_101 : f32 to vector<8x128xf32>
    %253 = arith.addf %251, %252 : vector<8x128xf32>
    %254 = vector.extract_strided_slice %245 {offsets = [0, 128], sizes = [8, 128], strides = [1, 1]} : vector<8x512xf32> to vector<8x128xf32>
    %cst_102 = arith.constant 5.000000e-01 : f32
    %255 = vector.broadcast %cst_102 : f32 to vector<8x128xf32>
    %256 = arith.mulf %255, %254 : vector<8x128xf32>
    %257 = math.tanh %256 : vector<8x128xf32>
    %cst_103 = arith.constant 5.000000e-01 : f32
    %258 = vector.broadcast %cst_103 : f32 to vector<8x128xf32>
    %259 = arith.mulf %258, %257 : vector<8x128xf32>
    %cst_104 = arith.constant 5.000000e-01 : f32
    %260 = vector.broadcast %cst_104 : f32 to vector<8x128xf32>
    %261 = arith.addf %259, %260 : vector<8x128xf32>
    %262 = vector.extract_strided_slice %245 {offsets = [0, 256], sizes = [8, 128], strides = [1, 1]} : vector<8x512xf32> to vector<8x128xf32>
    %263 = math.tanh %262 : vector<8x128xf32>
    %264 = vector.extract_strided_slice %245 {offsets = [0, 384], sizes = [8, 128], strides = [1, 1]} : vector<8x512xf32> to vector<8x128xf32>
    %cst_105 = arith.constant 5.000000e-01 : f32
    %265 = vector.broadcast %cst_105 : f32 to vector<8x128xf32>
    %266 = arith.mulf %265, %264 : vector<8x128xf32>
    %267 = math.tanh %266 : vector<8x128xf32>
    %cst_106 = arith.constant 5.000000e-01 : f32
    %268 = vector.broadcast %cst_106 : f32 to vector<8x128xf32>
    %269 = arith.mulf %268, %267 : vector<8x128xf32>
    %cst_107 = arith.constant 5.000000e-01 : f32
    %270 = vector.broadcast %cst_107 : f32 to vector<8x128xf32>
    %271 = arith.addf %269, %270 : vector<8x128xf32>
    %272 = arith.mulf %261, %236 : vector<8x128xf32>
    %273 = arith.mulf %253, %263 : vector<8x128xf32>
    %274 = arith.addf %272, %273 : vector<8x128xf32>
    %275 = math.tanh %274 : vector<8x128xf32>
    %276 = arith.mulf %271, %275 : vector<8x128xf32>
    %c7_i32 = arith.constant 7 : i32
    %277 = arith.index_cast %c7_i32 : i32 to index
    %c0_108 = arith.constant 0 : index
    %c0_109 = arith.constant 0 : index
    %278 = vector.load %arg8[%277, %c0_108, %c0_109] : memref<8x8x512xf32, #tpu.memory_space<vmem>>, vector<1x8x512xf32>
    %279 = vector.shape_cast %278 : vector<1x8x512xf32> to vector<8x512xf32>
    %280 = arith.truncf %276 : vector<8x128xf32> to vector<8x128xbf16>
    %c0_110 = arith.constant 0 : index
    %c0_111 = arith.constant 0 : index
    %281 = vector.load %arg7[%c0_110, %c0_111] : memref<128x512xbf16, #tpu.memory_space<vmem>>, vector<128x512xbf16>
    %cst_112 = arith.constant dense<0.000000e+00> : vector<8x512xf32>
    %282 = tpu.matmul %280, %281, %cst_112 {dimension_numbers = #tpu.dot_dimension_numbers<[1], [0], [0], [1], [0, 0, 1, 1], [], []>} : vector<8x128xbf16>, vector<128x512xbf16>, vector<8x512xf32> -> vector<8x512xf32>
    %283 = arith.addf %279, %282 : vector<8x512xf32>
    %284 = vector.extract_strided_slice %283 {offsets = [0, 0], sizes = [8, 128], strides = [1, 1]} : vector<8x512xf32> to vector<8x128xf32>
    %cst_113 = arith.constant 5.000000e-01 : f32
    %285 = vector.broadcast %cst_113 : f32 to vector<8x128xf32>
    %286 = arith.mulf %285, %284 : vector<8x128xf32>
    %287 = math.tanh %286 : vector<8x128xf32>
    %cst_114 = arith.constant 5.000000e-01 : f32
    %288 = vector.broadcast %cst_114 : f32 to vector<8x128xf32>
    %289 = arith.mulf %288, %287 : vector<8x128xf32>
    %cst_115 = arith.constant 5.000000e-01 : f32
    %290 = vector.broadcast %cst_115 : f32 to vector<8x128xf32>
    %291 = arith.addf %289, %290 : vector<8x128xf32>
    %292 = vector.extract_strided_slice %283 {offsets = [0, 128], sizes = [8, 128], strides = [1, 1]} : vector<8x512xf32> to vector<8x128xf32>
    %cst_116 = arith.constant 5.000000e-01 : f32
    %293 = vector.broadcast %cst_116 : f32 to vector<8x128xf32>
    %294 = arith.mulf %293, %292 : vector<8x128xf32>
    %295 = math.tanh %294 : vector<8x128xf32>
    %cst_117 = arith.constant 5.000000e-01 : f32
    %296 = vector.broadcast %cst_117 : f32 to vector<8x128xf32>
    %297 = arith.mulf %296, %295 : vector<8x128xf32>
    %cst_118 = arith.constant 5.000000e-01 : f32
    %298 = vector.broadcast %cst_118 : f32 to vector<8x128xf32>
    %299 = arith.addf %297, %298 : vector<8x128xf32>
    %300 = vector.extract_strided_slice %283 {offsets = [0, 256], sizes = [8, 128], strides = [1, 1]} : vector<8x512xf32> to vector<8x128xf32>
    %301 = math.tanh %300 : vector<8x128xf32>
    %302 = vector.extract_strided_slice %283 {offsets = [0, 384], sizes = [8, 128], strides = [1, 1]} : vector<8x512xf32> to vector<8x128xf32>
    %cst_119 = arith.constant 5.000000e-01 : f32
    %303 = vector.broadcast %cst_119 : f32 to vector<8x128xf32>
    %304 = arith.mulf %303, %302 : vector<8x128xf32>
    %305 = math.tanh %304 : vector<8x128xf32>
    %cst_120 = arith.constant 5.000000e-01 : f32
    %306 = vector.broadcast %cst_120 : f32 to vector<8x128xf32>
    %307 = arith.mulf %306, %305 : vector<8x128xf32>
    %cst_121 = arith.constant 5.000000e-01 : f32
    %308 = vector.broadcast %cst_121 : f32 to vector<8x128xf32>
    %309 = arith.addf %307, %308 : vector<8x128xf32>
    %310 = arith.mulf %299, %274 : vector<8x128xf32>
    %311 = arith.mulf %291, %301 : vector<8x128xf32>
    %312 = arith.addf %310, %311 : vector<8x128xf32>
    %313 = math.tanh %312 : vector<8x128xf32>
    %314 = arith.mulf %309, %313 : vector<8x128xf32>
    %c8_i32 = arith.constant 8 : i32
    %315 = arith.truncf %314 : vector<8x128xf32> to vector<8x128xbf16>
    %c0_122 = arith.constant 0 : index
    %c0_123 = arith.constant 0 : index
    %316 = vector.load %arg4[%c0_122, %c0_123] : memref<128x128xbf16, #tpu.memory_space<vmem>>, vector<128x128xbf16>
    %cst_124 = arith.constant dense<0.000000e+00> : vector<8x128xf32>
    %317 = tpu.matmul %315, %316, %cst_124 {dimension_numbers = #tpu.dot_dimension_numbers<[1], [0], [0], [1], [0, 0, 1, 1], [], []>} : vector<8x128xbf16>, vector<128x128xbf16>, vector<8x128xf32> -> vector<8x128xf32>
    %c0_125 = arith.constant 0 : index
    %c0_126 = arith.constant 0 : index
    %318 = vector.load %arg5[%c0_125, %c0_126] : memref<1x128xf32, #tpu.memory_space<vmem>>, vector<1x128xf32>
    %319 = vector.broadcast %318 : vector<1x128xf32> to vector<8x128xf32>
    %320 = arith.addf %317, %319 : vector<8x128xf32>
    %c0_127 = arith.constant 0 : index
    %c0_128 = arith.constant 0 : index
    %321 = vector.load %arg6[%c0_127, %c0_128] : memref<8x128xf32, #tpu.memory_space<vmem>>, vector<8x128xf32>
    tpu.vector_store %arg6[%c0_127, %c0_128], %320 {strides = array<i32>} : memref<8x128xf32, #tpu.memory_space<vmem>>, vector<8x128xf32>,
    return
  }
}

</mosaic_0001>

<bundles_post_ra>
// kernel: tpu_custom_call.1
= control target key start
LH: loop header
LB: loop body
LE: loop exit
PB: predicated region body
PF: predicated region fallthrough
CT: control target
= control target key end

     0   :  { %11 = vsyncpa [#allocation6], 0  ;;  %s2210_s0 = inlined_call_operand.vmem [shape: f32[64,16], index: 0, kind: input, shape index: {}]   ;;  %s2211_s1 = inlined_call_operand.hbm [shape: bf16[16,512], index: 1, kind: input, shape index: {}]   ;;  %s2212_s2 = inlined_call_operand.hbm [shape: bf16[128,512], index: 2, kind: input, shape index: {}]   ;;  %s2213_s3 = inlined_call_operand.vmem [shape: f32[1,512], index: 3, kind: input, shape index: {}]   ;;  %s2214_s4 = inlined_call_operand.vmem [shape: bf16[128,128], index: 4, kind: input, shape index: {}]   ;;  %s2215_s5 = inlined_call_operand.vmem [shape: f32[1,128], index: 5, kind: input, shape index: {}]   ;;  %s2216_s6 = inlined_call_operand.hbm [shape: f32[8,128], index: 6, kind: output, shape index: {}]  }
   0x1   :  { %12 = vsyncpa [#allocation7], 0  ;;  %s1586_s21 = smov [#allocation5]   ;;  %s1536_s25 = scalar_lea.hbm %s2211_s1, 512 }
   0x2   :  { %s20_s22 = sshll.u32 %s1586_s21, 4  ;;  %p1537_p0 = scmp.ne.s32.totalorder %s2211_s1, %s1536_s25  ;;  %s21_s22 = int_to_ptr.vmem [resolvable:$true] %s20_s22 }
   0x3   :  { %p1540_p1 = scmp.lt.u32.totalorder %s1536_s25, %s2211_s1 }
   0x5   :  { %p1542_p2 = pnand %p1540_p1, %p1537_p0 }
   0x7   :  { %1545 = shalt.err (!%p1542_p2)
}
   0x8   :  { %s1546_s30 = scalar_lea.vmem %s21_s22, 512  ;;  %p1551_p4 = scmp.lt.s32.totalorder %s21_s22, %s21_s22 }
   0x9   :  { %p1547_p3 = scmp.ne.s32.totalorder %s21_s22, %s1546_s30  ;;  %p1552_p5 = scmp.lt.s32.totalorder %s1546_s30, %s1546_s30 }
   0xb   :  { %p1553_p6 = por %p1552_p5, %p1551_p4 }
   0xd   :  { %p1554_p7 = pnand %p1553_p6, %p1547_p3 }
   0xf   :  { %1557 = shalt.err (!%p1554_p7)
}
  0x10   :  { %s1587_s7 = smov 256   ;;  %s1588_s8 = smov 16  }
  0x11   :  { %26 = dma.hbm_to_vmem [thread:$0]  %s2211_s1, 512, %s21_s22, [#allocation6], %s1587_s7, %s1587_s7, %s1588_s8  }
  0x12   :  { %1580 = dma.done.wait [#allocation6], 512  }
  0x13   :  { %1581 = vsyncadd [#allocation6], 4294966784  ;;  %s41_s11 = sld [smem:[#allocation0]]   ;;  %s1589_s12 = smov 512   ;;  %v2217_v0 = vmov 0   ;;  %vm130_vm0 = vcmask 130048   ;;  %v90_v17 = vlaneseq }
  0x14   :  { %53 = sst [smem:[#allocation10]] %s1589_s12  ;;  %175 = vmatprep.mubr.bf16.mxu0 %v2217_v0  ;;  %248 = vmatprep.mubr.bf16.mxu1 %v2217_v0  ;;  %s1591_s13 = smov 4  }
  0x15   :  { %55 = sst [smem:[#allocation10 + $0x1]] %s1589_s12  ;;  %s1592_s14 = smov 64   ;;  %v91_v18 = vshrl.u32 %v90_v17, 7 }
  0x16   :  { %57 = sst [smem:[#allocation10 + $0x2]] %s1591_s13  ;;  %s1593_s15 = smov 128  }
  0x17   :  { %59 = sst [smem:[#allocation10 + $0x3]] %s1592_s14  ;;  %s1594_s16 = smov 2   ;;  %v92_v19 = vsub.s32 0, %v91_v18  ;;  %v100_v20 = vsub.s32 2, %v91_v18  ;;  %v96_v22 = vsub.s32 1, %v91_v18  ;;  %v104_v23 = vsub.s32 3, %v91_v18 }
  0x18   :  { %61 = sst [smem:[#allocation10 + $0x4]] %s1593_s15  ;;  %s1595_s1 = smov [#allocation2]  }
  0x19   :  { %63 = sst [smem:[#allocation10 + $0x5]] %s1594_s16  ;;  %s49_s17 = sshll.u32 %s1595_s1, 4  ;;  %s50_s17 = int_to_ptr.vmem [resolvable:$true] %s49_s17 }
  0x1a   :  { %s1369_s18 = sshll.u32 %s41_s11, 26  ;;  %65 = sst [smem:[#allocation10 + $0x6]] %s1587_s7 }
  0x1b   :  { %s1370_s19 = sadd.s32 134217728, %s1369_s18  ;;  %67 = sst [smem:[#allocation10 + $0x7]] %s1592_s14 }
  0x1c   :  { %69 = sst [smem:[#allocation10 + $0x8]] %s1591_s13  ;;  %s1596_s20 = smov [#allocation4]  }
  0x1d   :  { %s1597_s21 = smov [#allocation9]  }
  0x1e   :  { %71 = dma.general %s2212_s2, 4096, %s50_s17, %s1596_s20, %s1597_s21, [#allocation10], %s1370_s19, 0  }
  0x1f   :  { %v1437_v1 = vld [vmem:[#allocation5 + $0x4] ss:$16 sps:$4 sm:$0xff]   ;;  %v1439_v2 = vld [vmem:[#allocation5 + $0xc] ss:$16 sps:$4 sm:$0xff]   ;;  %v1441_v3 = vld [vmem:[#allocation5] ss:$16 sps:$4 sm:$0xff]  }
  0x20   :  { %143 = vmatprep.subr.bf16.mxu0 %v1437_v1  ;;  %v1442_v4 = vld [vmem:[#allocation5 + $0x8] ss:$16 sps:$4 sm:$0xff]   ;;  %v72_v5 = vld [vmem:[%s2210_s0] sm:$0xff]  ;;  %216 = vmatprep.subr.bf16.mxu1 %v1439_v2  ;;  %v74_v8 = vld [vmem:[%s2210_s0 + $0x10] sm:$0xff] }
  0x21   :  { %v73_v6 = vld [vmem:[%s2210_s0 + $0x8] sm:$0xff]  ;;  %144 = vmatpush1.bf16.msra.mxu0 %v1441_v3  ;;  %217 = vmatpush1.bf16.msra.mxu1 %v1442_v4  ;;  %v75_v9 = vld [vmem:[%s2210_s0 + $0x18] sm:$0xff]  ;;  %v76_v11 = vld [vmem:[%s2210_s0 + $0x20] sm:$0xff] }
  0x22   :  { %v80_v7 = vpack.c.bf16 %v73_v6, %v72_v5  ;;  %v81_v10 = vpack.c.bf16 %v75_v9, %v74_v8  ;;  %v77_v12 = vld [vmem:[%s2210_s0 + $0x28] sm:$0xff]  ;;  %v78_v14 = vld [vmem:[%s2210_s0 + $0x30] sm:$0xff]  ;;  %v79_v15 = vld [vmem:[%s2210_s0 + $0x38] sm:$0xff] }
  0x23   :  { %v82_v13 = vpack.c.bf16 %v77_v12, %v76_v11  ;;  %v83_v16 = vpack.c.bf16 %v79_v15, %v78_v14  ;;  %v88_v21 = vld [vmem:[%s2213_s3] sm:$0xf] }
  0x24   :  { %1375 = vmatmul.mubr.msk.bf16.vlgmr.msra.gmra.mrb[0].mxu0 %vm130_vm0, %v80_v7  ;;  %1379 = vmatmul.mubr.msk.bf16.vlgmr.msra.gmra.mrb[0].mxu1 %vm130_vm0, %v80_v7  ;;  %v93_v24 = vrot.slane %v88_v21, %v92_v19  ;;  %v101_v25 = vrot.slane %v88_v21, %v100_v20  ;;  %v1694_v26 = vrot.slane %v88_v21, %v96_v22 }
  0x25   :  { %185 = vmatprep.mubr.bf16.mxu0 %v2217_v0  ;;  %258 = vmatprep.mubr.bf16.mxu1 %v2217_v0  ;;  %v1696_v27 = vrot.slane %v88_v21, %v104_v23 }
  0x2c   :  { %1376 = vmatmul.mubr.msk.bf16.gmra.mrb[4].mxu0 %vm130_vm0, %v81_v10  ;;  %1380 = vmatmul.mubr.msk.bf16.gmra.mrb[4].mxu1 %vm130_vm0, %v81_v10 }
  0x2d   :  { %195 = vmatprep.mubr.bf16.mxu0 %v2217_v0  ;;  %268 = vmatprep.mubr.bf16.mxu1 %v2217_v0 }
  0x34   :  { %1377 = vmatmul.mubr.msk.bf16.gmra.mrb[8].mxu0 %vm130_vm0, %v82_v13  ;;  %1381 = vmatmul.mubr.msk.bf16.gmra.mrb[8].mxu1 %vm130_vm0, %v82_v13 }
  0x35   :  { %205 = vmatprep.mubr.bf16.mxu0 %v2217_v0  ;;  %278 = vmatprep.mubr.bf16.mxu1 %v2217_v0 }
  0x3c   :  { %1378 = vmatmul.mubr.msk.bf16.gmra.mrb[12].mxu0 %vm130_vm0, %v83_v16  ;;  %1382 = vmatmul.mubr.msk.bf16.gmra.mrb[12].mxu1 %vm130_vm0, %v83_v16 }
  0xf7   :  { %v177_v28 = vpop.f32.mrb[0].mxu0  ;;  %v250_v29 = vpop.f32.mrb[0].mxu1 }
  0xf8   :  { %v1698_v30 = vadd.f32 %v177_v28, %v93_v24  ;;  %v1700_v31 = vadd.f32 %v250_v29, %v101_v25  ;;  %v179_v32 = vpop.f32.mrb[1].mxu0  ;;  %v252_v33 = vpop.f32.mrb[1].mxu1 }
  0xf9   :  { %v1703_v34 = vadd.f32 %v179_v32, %v1694_v26  ;;  %v1706_v35 = vadd.f32 %v252_v33, %v1696_v27  ;;  %v181_v36 = vpop.f32.mrb[2].mxu0  ;;  %v254_v37 = vpop.f32.mrb[2].mxu1 }
  0xfa   :  { %v1708_v38 = vadd.f32 %v181_v36, %v93_v24  ;;  %v1710_v39 = vadd.f32 %v254_v37, %v101_v25  ;;  %v183_v40 = vpop.f32.mrb[3].mxu0  ;;  %v256_v41 = vpop.f32.mrb[3].mxu1 }
  0xfb   :  { %v1713_v42 = vadd.f32 %v183_v40, %v1694_v26  ;;  %v1716_v43 = vadd.f32 %v256_v41, %v1696_v27 }
  0xff   :  { %v187_v44 = vpop.f32.mrb[4].mxu0  ;;  %v260_v45 = vpop.f32.mrb[4].mxu1 }
 0x100   :  { %v1718_v46 = vadd.f32 %v187_v44, %v93_v24  ;;  %v1720_v47 = vadd.f32 %v260_v45, %v101_v25  ;;  %v189_v48 = vpop.f32.mrb[5].mxu0  ;;  %v262_v49 = vpop.f32.mrb[5].mxu1 }
 0x101   :  { %v1723_v50 = vadd.f32 %v189_v48, %v1694_v26  ;;  %v1726_v51 = vadd.f32 %v262_v49, %v1696_v27  ;;  %v191_v52 = vpop.f32.mrb[6].mxu0  ;;  %v264_v53 = vpop.f32.mrb[6].mxu1 }
 0x102   :  { %v1728_v54 = vadd.f32 %v191_v52, %v93_v24  ;;  %v1730_v55 = vadd.f32 %v264_v53, %v101_v25  ;;  %v193_v56 = vpop.f32.mrb[7].mxu0  ;;  %v266_v57 = vpop.f32.mrb[7].mxu1 }
 0x103   :  { %v1733_v58 = vadd.f32 %v193_v56, %v1694_v26  ;;  %v1736_v59 = vadd.f32 %v266_v57, %v1696_v27 }
 0x104   :  { %2219 = vst [vmem:[#allocation14_spill] sm:$0xff] %v1730_v55 }
 0x105   :  { %2220 = vst [vmem:[#allocation15_spill] sm:$0xff] %v1736_v59 }
 0x107   :  { %v197_v60 = vpop.f32.mrb[8].mxu0  ;;  %v270_v61 = vpop.f32.mrb[8].mxu1 }
 0x108   :  { %v1738_v62 = vadd.f32 %v197_v60, %v93_v24  ;;  %v1740_v63 = vadd.f32 %v270_v61, %v101_v25  ;;  %v199_v1 = vpop.f32.mrb[9].mxu0  ;;  %v272_v2 = vpop.f32.mrb[9].mxu1 }
 0x109   :  { %v1743_v3 = vadd.f32 %v199_v1, %v1694_v26  ;;  %v1746_v4 = vadd.f32 %v272_v2, %v1696_v27  ;;  %v201_v5 = vpop.f32.mrb[10].mxu0  ;;  %v274_v6 = vpop.f32.mrb[10].mxu1 }
 0x10a   :  { %2221 = vst [vmem:[#allocation16_spill] sm:$0xff] %v1738_v62  ;;  %2222 = vst [vmem:[#allocation17_spill] sm:$0xff] %v1740_v63  ;;  %v1748_v7 = vadd.f32 %v201_v5, %v93_v24  ;;  %v1750_v8 = vadd.f32 %v274_v6, %v101_v25  ;;  %v203_v9 = vpop.f32.mrb[11].mxu0  ;;  %v276_v10 = vpop.f32.mrb[11].mxu1 }
 0x10b   :  { %2223 = vst [vmem:[#allocation18_spill] sm:$0xff] %v1743_v3  ;;  %2224 = vst [vmem:[#allocation19_spill] sm:$0xff] %v1746_v4  ;;  %v1753_v11 = vadd.f32 %v203_v9, %v1694_v26  ;;  %v1756_v12 = vadd.f32 %v276_v10, %v1696_v27 }
 0x10c   :  { %2225 = vst [vmem:[#allocation20_spill] sm:$0xff] %v1748_v7  ;;  %2226 = vst [vmem:[#allocation21_spill] sm:$0xff] %v1750_v8 }
 0x10d   :  { %2227 = vst [vmem:[#allocation22_spill] sm:$0xff] %v1753_v11  ;;  %2228 = vst [vmem:[#allocation23_spill] sm:$0xff] %v1756_v12 }
 0x10f   :  { %v207_v13 = vpop.f32.mrb[12].mxu0  ;;  %v280_v14 = vpop.f32.mrb[12].mxu1 }
 0x110   :  { %v1758_v15 = vadd.f32 %v207_v13, %v93_v24  ;;  %v1760_v16 = vadd.f32 %v280_v14, %v101_v25  ;;  %v209_v17 = vpop.f32.mrb[13].mxu0  ;;  %v282_v18 = vpop.f32.mrb[13].mxu1 }
 0x111   :  { %v1763_v19 = vadd.f32 %v209_v17, %v1694_v26  ;;  %v1766_v20 = vadd.f32 %v282_v18, %v1696_v27  ;;  %v211_v21 = vpop.f32.mrb[14].mxu0  ;;  %v284_v22 = vpop.f32.mrb[14].mxu1 }
 0x112   :  { %2229 = vst [vmem:[#allocation24_spill] sm:$0xff] %v1758_v15  ;;  %2230 = vst [vmem:[#allocation25_spill] sm:$0xff] %v1760_v16  ;;  %v1768_v23 = vadd.f32 %v211_v21, %v93_v24  ;;  %v1770_v28 = vadd.f32 %v284_v22, %v101_v25  ;;  %v213_v29 = vpop.f32.mrb[15].mxu0  ;;  %v286_v32 = vpop.f32.mrb[15].mxu1 }
 0x113   :  { %2231 = vst [vmem:[#allocation26_spill] sm:$0xff] %v1763_v19  ;;  %2232 = vst [vmem:[#allocation27_spill] sm:$0xff] %v1766_v20  ;;  %v1773_v33 = vadd.f32 %v213_v29, %v1694_v26  ;;  %v1776_v36 = vadd.f32 %v286_v32, %v1696_v27 }
 0x114   :  { %2233 = vst [vmem:[#allocation28_spill] sm:$0xff] %v1768_v23  ;;  %2234 = vst [vmem:[#allocation29_spill] sm:$0xff] %v1770_v28 }
 0x115   :  { %2235 = vst [vmem:[#allocation30_spill] sm:$0xff] %v1773_v33  ;;  %2236 = vst [vmem:[#allocation31_spill] sm:$0xff] %v1776_v36 }
 0x116   :  { %1582 = dma.done.wait [#allocation4], 4096 }
 0x117   :  { %1583 = vsyncadd [#allocation4], 4294963200  ;;  %393 = vmatprep.mubr.bf16.mxu0 %v2217_v0  ;;  %434 = vmatprep.mubr.bf16.mxu1 %v2217_v0  ;;  %v1780_v37 = vld [vmem:[#allocation2 + $0x8] sm:$0xff]  ;;  %v1782_v24 = vld [vmem:[#allocation2] sm:$0xff]  ;;  %v2237_v36 = vmov 0   ;;  %vm1599_vm1 = vmmov 0  }
 0x118   :  { %v1784_v25 = vld [vmem:[#allocation2 + $0x28] sm:$0xff]  ;;  %361 = vmatprep.subr.bf16.mxu0 %v1780_v37  ;;  %v1787_v40 = vld [vmem:[#allocation2 + $0x18] sm:$0xff]  ;;  %v1789_v26 = vld [vmem:[#allocation2 + $0x10] sm:$0xff]  ;;  %s1600_s30 = smov [#allocation8]  }
 0x119   :  { %362 = vmatpush1.bf16.msra.mxu0 %v1782_v24  ;;  %402 = vmatprep.subr.bf16.mxu1 %v1787_v40  ;;  %v1793_v27 = vld [vmem:[#allocation2 + $0x38] sm:$0xff]  ;;  %v1796_v41 = vld [vmem:[#allocation2 + $0x20] sm:$0xff]  ;;  %v1799_v44 = vld [vmem:[#allocation2 + $0x48] sm:$0xff]  ;;  %s1354_s7 = sshll.u32 %s1600_s30, 4  ;;  %s1355_s7 = int_to_ptr.vmem [resolvable:$true] %s1354_s7 }
 0x11a   :  { %363 = vmatprep.subr.bf16.mxu0 %v1784_v25  ;;  %403 = vmatpush1.bf16.msra.mxu1 %v1789_v26  ;;  %v1802_v45 = vld [vmem:[#allocation2 + $0x30] sm:$0xff]  ;;  %v1804_v48 = vld [vmem:[#allocation2 + $0x58] sm:$0xff]  ;;  %v1808_v49 = vld [vmem:[#allocation2 + $0x40] sm:$0xff]  ;;  %s1558_s8 = scalar_lea.vmem %s1355_s7, 128  ;;  %p1563_p9 = scmp.lt.s32.totalorder %s1355_s7, %s1355_s7 }
 0x11b   :  { %404 = vmatprep.subr.bf16.mxu1 %v1793_v27  ;;  %v1811_v52 = vld [vmem:[#allocation2 + $0x68] sm:$0xff]  ;;  %v1814_v53 = vld [vmem:[#allocation2 + $0x50] sm:$0xff]  ;;  %v1816_v56 = vld [vmem:[#allocation2 + $0x60] sm:$0xff]  ;;  %p1559_p8 = scmp.ne.s32.totalorder %s1355_s7, %s1558_s8  ;;  %p1564_p10 = scmp.lt.s32.totalorder %s1558_s8, %s1558_s8 }
 0x11c   :  { %v1818_v57 = vld [vmem:[#allocation2 + $0x78] sm:$0xff]  ;;  %v1821_v60 = vld [vmem:[#allocation2 + $0x88] sm:$0xff]  ;;  %v1823_v61 = vld [vmem:[#allocation2 + $0x70] sm:$0xff] }
 0x11d   :  { %364 = vmatpush1.bf16.msra.mxu0 %v1796_v41  ;;  %v1827_v1 = vld [vmem:[#allocation2 + $0x98] sm:$0xff]  ;;  %v1830_v2 = vld [vmem:[#allocation2 + $0x80] sm:$0xff]  ;;  %v1835_v5 = vld [vmem:[#allocation2 + $0xa8] sm:$0xff]  ;;  %p1565_p11 = por %p1564_p10, %p1563_p9 }
 0x11e   :  { %365 = vmatprep.subr.bf16.mxu0 %v1799_v44  ;;  %405 = vmatpush1.bf16.msra.mxu1 %v1802_v45  ;;  %v1838_v6 = vld [vmem:[#allocation2 + $0x90] sm:$0xff]  ;;  %v1840_v9 = vld [vmem:[#allocation2 + $0xb8] sm:$0xff]  ;;  %v1844_v10 = vld [vmem:[#allocation2 + $0xa0] sm:$0xff] }
 0x11f   :  { %406 = vmatprep.subr.bf16.mxu1 %v1804_v48  ;;  %v1847_v13 = vld [vmem:[#allocation2 + $0xc8] sm:$0xff]  ;;  %v1850_v14 = vld [vmem:[#allocation2 + $0xb0] sm:$0xff]  ;;  %v1852_v17 = vld [vmem:[#allocation2 + $0xd8] sm:$0xff]  ;;  %p1566_p12 = pnand %p1565_p11, %p1559_p8 }
 0x120   :  { %v1856_v18 = vld [vmem:[#allocation2 + $0xc0] sm:$0xff]  ;;  %v1859_v21 = vld [vmem:[#allocation2 + $0xe8] sm:$0xff]  ;;  %v1862_v22 = vld [vmem:[#allocation2 + $0xd0] sm:$0xff] }
 0x121   :  { %366 = vmatpush1.bf16.msra.mxu0 %v1808_v49  ;;  %v1864_v29 = vld [vmem:[#allocation2 + $0xf8] sm:$0xff]  ;;  %v1868_v32 = vld [vmem:[#allocation2 + $0xe0] sm:$0xff]  ;;  %v1872_v0 = vld [vmem:[#allocation2 + $0xf0] sm:$0xff] }
 0x122   :  { %367 = vmatprep.subr.bf16.mxu0 %v1811_v52  ;;  %407 = vmatpush1.bf16.msra.mxu1 %v1814_v53 }
 0x123   :  { %408 = vmatprep.subr.bf16.mxu1 %v1818_v57 }
 0x125   :  { %368 = vmatpush1.bf16.msra.mxu0 %v1816_v56 }
 0x126   :  { %369 = vmatprep.subr.bf16.mxu0 %v1821_v60  ;;  %409 = vmatpush1.bf16.msra.mxu1 %v1823_v61 }
 0x127   :  { %410 = vmatprep.subr.bf16.mxu1 %v1827_v1 }
 0x129   :  { %370 = vmatpush1.bf16.msra.mxu0 %v1830_v2 }
 0x12a   :  { %371 = vmatprep.subr.bf16.mxu0 %v1835_v5  ;;  %411 = vmatpush1.bf16.msra.mxu1 %v1838_v6 }
 0x12b   :  { %412 = vmatprep.subr.bf16.mxu1 %v1840_v9 }
 0x12d   :  { %372 = vmatpush1.bf16.msra.mxu0 %v1844_v10 }
 0x12e   :  { %373 = vmatprep.subr.bf16.mxu0 %v1847_v13  ;;  %413 = vmatpush1.bf16.msra.mxu1 %v1850_v14 }
 0x12f   :  { %414 = vmatprep.subr.bf16.mxu1 %v1852_v17 }
 0x131   :  { %374 = vmatpush1.bf16.msra.mxu0 %v1856_v18 }
 0x132   :  { %375 = vmatprep.subr.bf16.mxu0 %v1859_v21  ;;  %415 = vmatpush1.bf16.msra.mxu1 %v1862_v22 }
 0x133   :  { %416 = vmatprep.subr.bf16.mxu1 %v1864_v29 }
 0x135   :  { %376 = vmatpush1.bf16.msra.mxu0 %v1868_v32 }
 0x136   :  { %417 = vmatpush1.bf16.msra.mxu1 %v1872_v0  ;;  %471 = vmatprep.subr.bf16.mxu0 %v1780_v37 }
 0x137   :  { %512 = vmatprep.subr.bf16.mxu1 %v1787_v40 }
 0x138   :  { %394 = vmatmul.mubr.bf16.vlgmr.msra.gmra.mrb[16].mxu0 %v2237_v36 }
 0x139   :  { %435 = vmatmul.mubr.bf16.vlgmr.msra.gmra.mrb[16].mxu1 %v2237_v36  ;;  %472 = vmatpush1.bf16.msra.mxu0 %v1782_v24 }
 0x13a   :  { %513 = vmatpush1.bf16.msra.mxu1 %v1789_v26  ;;  %473 = vmatprep.subr.bf16.mxu0 %v1784_v25 }
 0x13b   :  { %514 = vmatprep.subr.bf16.mxu1 %v1793_v27  ;;  %503 = vmatprep.mubr.bf16.mxu0 %v2237_v36 }
 0x13c   :  { %544 = vmatprep.mubr.bf16.mxu1 %v2237_v36 }
 0x13d   :  { %474 = vmatpush1.bf16.msra.mxu0 %v1796_v41 }
 0x13e   :  { %515 = vmatpush1.bf16.msra.mxu1 %v1802_v45  ;;  %475 = vmatprep.subr.bf16.mxu0 %v1799_v44 }
 0x13f   :  { %516 = vmatprep.subr.bf16.mxu1 %v1804_v48 }
 0x141   :  { %476 = vmatpush1.bf16.msra.mxu0 %v1808_v49 }
 0x142   :  { %517 = vmatpush1.bf16.msra.mxu1 %v1814_v53  ;;  %477 = vmatprep.subr.bf16.mxu0 %v1811_v52 }
 0x143   :  { %518 = vmatprep.subr.bf16.mxu1 %v1818_v57 }
 0x145   :  { %478 = vmatpush1.bf16.msra.mxu0 %v1816_v56 }
 0x146   :  { %519 = vmatpush1.bf16.msra.mxu1 %v1823_v61  ;;  %479 = vmatprep.subr.bf16.mxu0 %v1821_v60 }
 0x147   :  { %520 = vmatprep.subr.bf16.mxu1 %v1827_v1 }
 0x149   :  { %480 = vmatpush1.bf16.msra.mxu0 %v1830_v2 }
 0x14a   :  { %521 = vmatpush1.bf16.msra.mxu1 %v1838_v6  ;;  %481 = vmatprep.subr.bf16.mxu0 %v1835_v5 }
 0x14b   :  { %522 = vmatprep.subr.bf16.mxu1 %v1840_v9 }
 0x14d   :  { %482 = vmatpush1.bf16.msra.mxu0 %v1844_v10 }
 0x14e   :  { %523 = vmatpush1.bf16.msra.mxu1 %v1850_v14  ;;  %483 = vmatprep.subr.bf16.mxu0 %v1847_v13 }
 0x14f   :  { %524 = vmatprep.subr.bf16.mxu1 %v1852_v17 }
 0x151   :  { %484 = vmatpush1.bf16.msra.mxu0 %v1856_v18 }
 0x152   :  { %525 = vmatpush1.bf16.msra.mxu1 %v1862_v22  ;;  %485 = vmatprep.subr.bf16.mxu0 %v1859_v21 }
 0x153   :  { %526 = vmatprep.subr.bf16.mxu1 %v1864_v29 }
 0x155   :  { %486 = vmatpush1.bf16.msra.mxu0 %v1868_v32 }
 0x156   :  { %527 = vmatpush1.bf16.msra.mxu1 %v1872_v0  ;;  %581 = vmatprep.subr.bf16.mxu0 %v1780_v37 }
 0x157   :  { %622 = vmatprep.subr.bf16.mxu1 %v1787_v40 }
 0x20b   :  { %v395_v28 = vpop.f32.mrb[16].mxu0 }
 0x20c   :  { %v443_v33 = vadd.f32 %v395_v28, %v1698_v30  ;;  %v397_v23 = vpop.f32.mrb[17].mxu0  ;;  %v436_v20 = vpop.f32.mrb[16].mxu1 }
 0x20d   :  { %v444_v16 = vadd.f32 %v397_v23, %v1703_v34  ;;  %v399_v19 = vpop.f32.mrb[18].mxu0  ;;  %v438_v15 = vpop.f32.mrb[17].mxu1  ;;  %v445_v11 = vadd.f32 %v436_v20, %v1700_v31 }
 0x20e   :  { %v447_v12 = vmul.f32 0.5, %v443_v33  ;;  %v400_v8 = vpop.f32.mrb[19].mxu0  ;;  %v440_v7 = vpop.f32.mrb[18].mxu1  ;;  %v446_v3 = vadd.f32 %v438_v15, %v1706_v35 }
 0x20f   :  { %v451_v4 = vmul.f32 0.5, %v444_v16  ;;  %v441_v63 = vpop.f32.mrb[19].mxu1 }
 0x210   :  { %1451 = vtanh.f32 %v447_v12  ;;  %v456_v62 = vmul.f32 0.5, %v446_v3 }
 0x211   :  { %1453 = vtanh.f32 %v451_v4 }
 0x212   :  { %1455 = vtanh.f32 %v445_v11 }
 0x213   :  { %1457 = vtanh.f32 %v456_v62 }
 0x21a   :  { %v1452_v30 = vpop.eup %1451 }
 0x21b   :  { %v1454_v28 = vpop.eup %1453  ;;  %v449_v59 = vmul.f32 0.5, %v1452_v30 }
 0x21c   :  { %v1456_v55 = vpop.eup %1455  ;;  %v453_v34 = vmul.f32 0.5, %v1454_v28 }
 0x21d   :  { %v450_v19 = vadd.f32 0.5, %v449_v59  ;;  %v1458_v63 = vpop.eup %1457 }
 0x21e   :  { %v454_v23 = vadd.f32 0.5, %v453_v34  ;;  %v458_v4 = vmul.f32 0.5, %v1458_v63 }
 0x21f   :  { %v461_v8 = vmul.f32 %v1456_v55, %v450_v19 }
 0x220   :  { %v460_v33 = vmul.f32 0.0, %v454_v23  ;;  %v459_v7 = vadd.f32 0.5, %v458_v4 }
 0x222   :  { %v1918_v31 = vadd.f32 %v461_v8, %v460_v33 }
 0x224   :  { %1459 = vtanh.f32 %v1918_v31 }
 0x22e   :  { %v1460_v11 = vpop.eup %1459 }
 0x22f   :  { %v464_v35 = vmul.f32 %v1460_v11, %v459_v7 }
 0x231   :  { %v470_v3 = vpack.c.bf16 %v464_v35, %v464_v35 }
 0x233   :  { %504 = vmatmul.mubr.bf16.vlgmr.msra.gmra.mrb[20].mxu0 %v470_v3  ;;  %545 = vmatmul.mubr.bf16.vlgmr.msra.gmra.mrb[20].mxu1 %v470_v3 }
 0x234   :  { %582 = vmatpush1.bf16.msra.mxu0 %v1782_v24  ;;  %623 = vmatpush1.bf16.msra.mxu1 %v1789_v26 }
 0x235   :  { %583 = vmatprep.subr.bf16.mxu0 %v1784_v25  ;;  %624 = vmatprep.subr.bf16.mxu1 %v1793_v27 }
 0x236   :  { %613 = vmatprep.mubr.bf16.mxu0 %v2237_v36  ;;  %654 = vmatprep.mubr.bf16.mxu1 %v2237_v36 }
 0x238   :  { %584 = vmatpush1.bf16.msra.mxu0 %v1796_v41  ;;  %625 = vmatpush1.bf16.msra.mxu1 %v1802_v45 }
 0x239   :  { %585 = vmatprep.subr.bf16.mxu0 %v1799_v44  ;;  %626 = vmatprep.subr.bf16.mxu1 %v1804_v48 }
 0x23c   :  { %586 = vmatpush1.bf16.msra.mxu0 %v1808_v49  ;;  %627 = vmatpush1.bf16.msra.mxu1 %v1814_v53 }
 0x23d   :  { %587 = vmatprep.subr.bf16.mxu0 %v1811_v52  ;;  %628 = vmatprep.subr.bf16.mxu1 %v1818_v57 }
 0x240   :  { %588 = vmatpush1.bf16.msra.mxu0 %v1816_v56  ;;  %629 = vmatpush1.bf16.msra.mxu1 %v1823_v61 }
 0x241   :  { %589 = vmatprep.subr.bf16.mxu0 %v1821_v60  ;;  %630 = vmatprep.subr.bf16.mxu1 %v1827_v1 }
 0x244   :  { %590 = vmatpush1.bf16.msra.mxu0 %v1830_v2  ;;  %631 = vmatpush1.bf16.msra.mxu1 %v1838_v6 }
 0x245   :  { %591 = vmatprep.subr.bf16.mxu0 %v1835_v5  ;;  %632 = vmatprep.subr.bf16.mxu1 %v1840_v9 }
 0x248   :  { %592 = vmatpush1.bf16.msra.mxu0 %v1844_v10  ;;  %633 = vmatpush1.bf16.msra.mxu1 %v1850_v14 }
 0x249   :  { %593 = vmatprep.subr.bf16.mxu0 %v1847_v13  ;;  %634 = vmatprep.subr.bf16.mxu1 %v1852_v17 }
 0x24c   :  { %594 = vmatpush1.bf16.msra.mxu0 %v1856_v18  ;;  %635 = vmatpush1.bf16.msra.mxu1 %v1862_v22 }
 0x24d   :  { %595 = vmatprep.subr.bf16.mxu0 %v1859_v21  ;;  %636 = vmatprep.subr.bf16.mxu1 %v1864_v29 }
 0x250   :  { %596 = vmatpush1.bf16.msra.mxu0 %v1868_v32  ;;  %637 = vmatpush1.bf16.msra.mxu1 %v1872_v0 }
 0x251   :  { %691 = vmatprep.subr.bf16.mxu0 %v1780_v37  ;;  %732 = vmatprep.subr.bf16.mxu1 %v1787_v40 }
 0x306   :  { %v505_v55 = vpop.f32.mrb[20].mxu0  ;;  %v546_v59 = vpop.f32.mrb[20].mxu1 }
 0x307   :  { %v553_v62 = vadd.f32 %v505_v55, %v1708_v38  ;;  %v507_v12 = vpop.f32.mrb[21].mxu0  ;;  %v548_v15 = vpop.f32.mrb[21].mxu1  ;;  %v555_v8 = vadd.f32 %v546_v59, %v1710_v39 }
 0x308   :  { %v554_v16 = vadd.f32 %v507_v12, %v1713_v42  ;;  %v509_v20 = vpop.f32.mrb[22].mxu0  ;;  %v550_v30 = vpop.f32.mrb[22].mxu1  ;;  %v556_v33 = vadd.f32 %v548_v15, %v1716_v43 }
 0x309   :  { %v557_v28 = vmul.f32 0.5, %v553_v62  ;;  %v510_v34 = vpop.f32.mrb[23].mxu0  ;;  %v551_v19 = vpop.f32.mrb[23].mxu1 }
 0x30a   :  { %v561_v23 = vmul.f32 0.5, %v554_v16  ;;  %v566_v63 = vmul.f32 0.5, %v556_v33 }
 0x30b   :  { %1461 = vtanh.f32 %v557_v28 }
 0x30c   :  { %1463 = vtanh.f32 %v561_v23 }
 0x30d   :  { %1465 = vtanh.f32 %v555_v8 }
 0x30e   :  { %1467 = vtanh.f32 %v566_v63 }
 0x315   :  { %v1462_v4 = vpop.eup %1461 }
 0x316   :  { %v1464_v38 = vpop.eup %1463  ;;  %v559_v7 = vmul.f32 0.5, %v1462_v4 }
 0x317   :  { %v563_v11 = vmul.f32 0.5, %v1464_v38  ;;  %v1466_v35 = vpop.eup %1465 }
 0x318   :  { %v560_v42 = vadd.f32 0.5, %v559_v7  ;;  %v1468_v39 = vpop.eup %1467 }
 0x319   :  { %v564_v3 = vadd.f32 0.5, %v563_v11  ;;  %v568_v59 = vmul.f32 0.5, %v1468_v39 }
 0x31a   :  { %v571_v55 = vmul.f32 %v1466_v35, %v560_v42 }
 0x31b   :  { %v570_v62 = vmul.f32 %v564_v3, %v1918_v31  ;;  %v569_v16 = vadd.f32 0.5, %v568_v59 }
 0x31d   :  { %v1960_v12 = vadd.f32 %v571_v55, %v570_v62 }
 0x31f   :  { %1469 = vtanh.f32 %v1960_v12 }
 0x329   :  { %v1470_v43 = vpop.eup %1469 }
 0x32a   :  { %v574_v15 = vmul.f32 %v1470_v43, %v569_v16 }
 0x32c   :  { %v580_v20 = vpack.c.bf16 %v574_v15, %v574_v15 }
 0x32e   :  { %614 = vmatmul.mubr.bf16.vlgmr.msra.gmra.mrb[24].mxu0 %v580_v20  ;;  %655 = vmatmul.mubr.bf16.vlgmr.msra.gmra.mrb[24].mxu1 %v580_v20 }
 0x32f   :  { %692 = vmatpush1.bf16.msra.mxu0 %v1782_v24  ;;  %733 = vmatpush1.bf16.msra.mxu1 %v1789_v26 }
 0x330   :  { %693 = vmatprep.subr.bf16.mxu0 %v1784_v25  ;;  %734 = vmatprep.subr.bf16.mxu1 %v1793_v27 }
 0x331   :  { %723 = vmatprep.mubr.bf16.mxu0 %v2237_v36  ;;  %764 = vmatprep.mubr.bf16.mxu1 %v2237_v36 }
 0x333   :  { %694 = vmatpush1.bf16.msra.mxu0 %v1796_v41  ;;  %735 = vmatpush1.bf16.msra.mxu1 %v1802_v45 }
 0x334   :  { %695 = vmatprep.subr.bf16.mxu0 %v1799_v44  ;;  %736 = vmatprep.subr.bf16.mxu1 %v1804_v48 }
 0x337   :  { %696 = vmatpush1.bf16.msra.mxu0 %v1808_v49  ;;  %737 = vmatpush1.bf16.msra.mxu1 %v1814_v53 }
 0x338   :  { %697 = vmatprep.subr.bf16.mxu0 %v1811_v52  ;;  %738 = vmatprep.subr.bf16.mxu1 %v1818_v57 }
 0x33b   :  { %698 = vmatpush1.bf16.msra.mxu0 %v1816_v56  ;;  %739 = vmatpush1.bf16.msra.mxu1 %v1823_v61 }
 0x33c   :  { %699 = vmatprep.subr.bf16.mxu0 %v1821_v60  ;;  %740 = vmatprep.subr.bf16.mxu1 %v1827_v1 }
 0x33f   :  { %700 = vmatpush1.bf16.msra.mxu0 %v1830_v2  ;;  %741 = vmatpush1.bf16.msra.mxu1 %v1838_v6 }
 0x340   :  { %701 = vmatprep.subr.bf16.mxu0 %v1835_v5  ;;  %742 = vmatprep.subr.bf16.mxu1 %v1840_v9 }
 0x343   :  { %702 = vmatpush1.bf16.msra.mxu0 %v1844_v10  ;;  %743 = vmatpush1.bf16.msra.mxu1 %v1850_v14 }
 0x344   :  { %703 = vmatprep.subr.bf16.mxu0 %v1847_v13  ;;  %744 = vmatprep.subr.bf16.mxu1 %v1852_v17 }
 0x347   :  { %704 = vmatpush1.bf16.msra.mxu0 %v1856_v18  ;;  %745 = vmatpush1.bf16.msra.mxu1 %v1862_v22 }
 0x348   :  { %705 = vmatprep.subr.bf16.mxu0 %v1859_v21  ;;  %746 = vmatprep.subr.bf16.mxu1 %v1864_v29 }
 0x34b   :  { %706 = vmatpush1.bf16.msra.mxu0 %v1868_v32  ;;  %747 = vmatpush1.bf16.msra.mxu1 %v1872_v0 }
 0x34c   :  { %801 = vmatprep.subr.bf16.mxu0 %v1780_v37  ;;  %842 = vmatprep.subr.bf16.mxu1 %v1787_v40 }
 0x401   :  { %v615_v31 = vpop.f32.mrb[24].mxu0  ;;  %v656_v30 = vpop.f32.mrb[24].mxu1 }
 0x402   :  { %v663_v28 = vadd.f32 %v615_v31, %v1718_v46  ;;  %v617_v34 = vpop.f32.mrb[25].mxu0  ;;  %v658_v19 = vpop.f32.mrb[25].mxu1  ;;  %v665_v11 = vadd.f32 %v656_v30, %v1720_v47 }
 0x403   :  { %v664_v23 = vadd.f32 %v617_v34, %v1723_v50  ;;  %v619_v8 = vpop.f32.mrb[26].mxu0  ;;  %v660_v33 = vpop.f32.mrb[26].mxu1  ;;  %v666_v42 = vadd.f32 %v658_v19, %v1726_v51 }
 0x404   :  { %v667_v63 = vmul.f32 0.5, %v663_v28  ;;  %v620_v4 = vpop.f32.mrb[27].mxu0  ;;  %v661_v38 = vpop.f32.mrb[27].mxu1 }
 0x405   :  { %v671_v7 = vmul.f32 0.5, %v664_v23  ;;  %v676_v35 = vmul.f32 0.5, %v666_v42 }
 0x406   :  { %1471 = vtanh.f32 %v667_v63 }
 0x407   :  { %1473 = vtanh.f32 %v671_v7 }
 0x408   :  { %1475 = vtanh.f32 %v665_v11 }
 0x409   :  { %1477 = vtanh.f32 %v676_v35  ;;  %v2238_v35 = vld [vmem:[#allocation14_spill] sm:$0xff] }
 0x410   :  { %v1472_v3 = vpop.eup %1471 }
 0x411   :  { %v1474_v46 = vpop.eup %1473  ;;  %v669_v55 = vmul.f32 0.5, %v1472_v3 }
 0x412   :  { %v673_v62 = vmul.f32 0.5, %v1474_v46  ;;  %v1476_v39 = vpop.eup %1475  ;;  %v2239_v46 = vld [vmem:[#allocation15_spill] sm:$0xff] }
 0x413   :  { %v670_v50 = vadd.f32 0.5, %v669_v55  ;;  %v1478_v47 = vpop.eup %1477 }
 0x414   :  { %v674_v59 = vadd.f32 0.5, %v673_v62  ;;  %v678_v20 = vmul.f32 0.5, %v1478_v47 }
 0x415   :  { %v681_v16 = vmul.f32 %v1476_v39, %v670_v50 }
 0x416   :  { %v680_v43 = vmul.f32 %v674_v59, %v1960_v12  ;;  %v679_v31 = vadd.f32 0.5, %v678_v20 }
 0x418   :  { %v2002_v15 = vadd.f32 %v681_v16, %v680_v43 }
 0x41a   :  { %1479 = vtanh.f32 %v2002_v15 }
 0x424   :  { %v1480_v51 = vpop.eup %1479 }
 0x425   :  { %v684_v30 = vmul.f32 %v1480_v51, %v679_v31 }
 0x427   :  { %v690_v28 = vpack.c.bf16 %v684_v30, %v684_v30 }
 0x429   :  { %724 = vmatmul.mubr.bf16.vlgmr.msra.gmra.mrb[28].mxu0 %v690_v28  ;;  %765 = vmatmul.mubr.bf16.vlgmr.msra.gmra.mrb[28].mxu1 %v690_v28 }
 0x42a   :  { %802 = vmatpush1.bf16.msra.mxu0 %v1782_v24  ;;  %843 = vmatpush1.bf16.msra.mxu1 %v1789_v26 }
 0x42b   :  { %803 = vmatprep.subr.bf16.mxu0 %v1784_v25  ;;  %844 = vmatprep.subr.bf16.mxu1 %v1793_v27 }
 0x42c   :  { %833 = vmatprep.mubr.bf16.mxu0 %v2237_v36  ;;  %874 = vmatprep.mubr.bf16.mxu1 %v2237_v36 }
 0x42e   :  { %804 = vmatpush1.bf16.msra.mxu0 %v1796_v41  ;;  %845 = vmatpush1.bf16.msra.mxu1 %v1802_v45 }
 0x42f   :  { %805 = vmatprep.subr.bf16.mxu0 %v1799_v44  ;;  %846 = vmatprep.subr.bf16.mxu1 %v1804_v48 }
 0x432   :  { %806 = vmatpush1.bf16.msra.mxu0 %v1808_v49  ;;  %847 = vmatpush1.bf16.msra.mxu1 %v1814_v53 }
 0x433   :  { %807 = vmatprep.subr.bf16.mxu0 %v1811_v52  ;;  %848 = vmatprep.subr.bf16.mxu1 %v1818_v57 }
 0x436   :  { %808 = vmatpush1.bf16.msra.mxu0 %v1816_v56  ;;  %849 = vmatpush1.bf16.msra.mxu1 %v1823_v61 }
 0x437   :  { %809 = vmatprep.subr.bf16.mxu0 %v1821_v60  ;;  %850 = vmatprep.subr.bf16.mxu1 %v1827_v1 }
 0x43a   :  { %810 = vmatpush1.bf16.msra.mxu0 %v1830_v2  ;;  %851 = vmatpush1.bf16.msra.mxu1 %v1838_v6 }
 0x43b   :  { %811 = vmatprep.subr.bf16.mxu0 %v1835_v5  ;;  %852 = vmatprep.subr.bf16.mxu1 %v1840_v9 }
 0x43e   :  { %812 = vmatpush1.bf16.msra.mxu0 %v1844_v10  ;;  %853 = vmatpush1.bf16.msra.mxu1 %v1850_v14 }
 0x43f   :  { %813 = vmatprep.subr.bf16.mxu0 %v1847_v13  ;;  %854 = vmatprep.subr.bf16.mxu1 %v1852_v17 }
 0x442   :  { %814 = vmatpush1.bf16.msra.mxu0 %v1856_v18  ;;  %855 = vmatpush1.bf16.msra.mxu1 %v1862_v22 }
 0x443   :  { %815 = vmatprep.subr.bf16.mxu0 %v1859_v21  ;;  %856 = vmatprep.subr.bf16.mxu1 %v1864_v29 }
 0x446   :  { %816 = vmatpush1.bf16.msra.mxu0 %v1868_v32  ;;  %857 = vmatpush1.bf16.msra.mxu1 %v1872_v0 }
 0x447   :  { %911 = vmatprep.subr.bf16.mxu0 %v1780_v37  ;;  %952 = vmatprep.subr.bf16.mxu1 %v1787_v40 }
 0x4fc   :  { %v725_v12 = vpop.f32.mrb[28].mxu0  ;;  %v766_v34 = vpop.f32.mrb[28].mxu1 }
 0x4fd   :  { %v773_v19 = vadd.f32 %v725_v12, %v1728_v54  ;;  %v727_v23 = vpop.f32.mrb[29].mxu0  ;;  %v768_v8 = vpop.f32.mrb[29].mxu1  ;;  %v775_v3 = vadd.f32 %v766_v34, %v2238_v35 }
 0x4fe   :  { %v774_v33 = vadd.f32 %v727_v23, %v1733_v58  ;;  %v729_v63 = vpop.f32.mrb[30].mxu0  ;;  %v770_v4 = vpop.f32.mrb[30].mxu1  ;;  %v776_v55 = vadd.f32 %v768_v8, %v2239_v46  ;;  %v2240_v8 = vld [vmem:[#allocation16_spill] sm:$0xff] }
 0x4ff   :  { %v777_v38 = vmul.f32 0.5, %v773_v19  ;;  %v730_v7 = vpop.f32.mrb[31].mxu0  ;;  %v771_v11 = vpop.f32.mrb[31].mxu1 }
 0x500   :  { %v781_v42 = vmul.f32 0.5, %v774_v33  ;;  %v786_v62 = vmul.f32 0.5, %v776_v55 }
 0x501   :  { %1481 = vtanh.f32 %v777_v38  ;;  %v2241_v38 = vld [vmem:[#allocation18_spill] sm:$0xff] }
 0x502   :  { %1483 = vtanh.f32 %v781_v42 }
 0x503   :  { %1485 = vtanh.f32 %v775_v3 }
 0x504   :  { %1487 = vtanh.f32 %v786_v62  ;;  %v2242_v62 = vld [vmem:[#allocation17_spill] sm:$0xff] }
 0x50b   :  { %v1482_v50 = vpop.eup %1481 }
 0x50c   :  { %v1484_v54 = vpop.eup %1483  ;;  %v779_v39 = vmul.f32 0.5, %v1482_v50 }
 0x50d   :  { %v783_v59 = vmul.f32 0.5, %v1484_v54  ;;  %v1486_v16 = vpop.eup %1485  ;;  %v2243_v54 = vld [vmem:[#allocation19_spill] sm:$0xff] }
 0x50e   :  { %v780_v58 = vadd.f32 0.5, %v779_v39  ;;  %v1488_v51 = vpop.eup %1487 }
 0x50f   :  { %v784_v43 = vadd.f32 0.5, %v783_v59  ;;  %v788_v30 = vmul.f32 0.5, %v1488_v51 }
 0x510   :  { %v791_v47 = vmul.f32 %v1486_v16, %v780_v58 }
 0x511   :  { %v790_v20 = vmul.f32 %v784_v43, %v2002_v15  ;;  %v789_v28 = vadd.f32 0.5, %v788_v30 }
 0x513   :  { %v2044_v31 = vadd.f32 %v791_v47, %v790_v20 }
 0x515   :  { %1489 = vtanh.f32 %v2044_v31 }
 0x51f   :  { %v1490_v12 = vpop.eup %1489 }
 0x520   :  { %v794_v34 = vmul.f32 %v1490_v12, %v789_v28 }
 0x522   :  { %v800_v19 = vpack.c.bf16 %v794_v34, %v794_v34 }
 0x524   :  { %834 = vmatmul.mubr.bf16.vlgmr.msra.gmra.mrb[32].mxu0 %v800_v19  ;;  %875 = vmatmul.mubr.bf16.vlgmr.msra.gmra.mrb[32].mxu1 %v800_v19 }
 0x525   :  { %912 = vmatpush1.bf16.msra.mxu0 %v1782_v24  ;;  %953 = vmatpush1.bf16.msra.mxu1 %v1789_v26 }
 0x526   :  { %913 = vmatprep.subr.bf16.mxu0 %v1784_v25  ;;  %954 = vmatprep.subr.bf16.mxu1 %v1793_v27 }
 0x527   :  { %943 = vmatprep.mubr.bf16.mxu0 %v2237_v36  ;;  %984 = vmatprep.mubr.bf16.mxu1 %v2237_v36 }
 0x529   :  { %914 = vmatpush1.bf16.msra.mxu0 %v1796_v41  ;;  %955 = vmatpush1.bf16.msra.mxu1 %v1802_v45 }
 0x52a   :  { %915 = vmatprep.subr.bf16.mxu0 %v1799_v44  ;;  %956 = vmatprep.subr.bf16.mxu1 %v1804_v48 }
 0x52d   :  { %916 = vmatpush1.bf16.msra.mxu0 %v1808_v49  ;;  %957 = vmatpush1.bf16.msra.mxu1 %v1814_v53 }
 0x52e   :  { %917 = vmatprep.subr.bf16.mxu0 %v1811_v52  ;;  %958 = vmatprep.subr.bf16.mxu1 %v1818_v57 }
 0x531   :  { %918 = vmatpush1.bf16.msra.mxu0 %v1816_v56  ;;  %959 = vmatpush1.bf16.msra.mxu1 %v1823_v61 }
 0x532   :  { %919 = vmatprep.subr.bf16.mxu0 %v1821_v60  ;;  %960 = vmatprep.subr.bf16.mxu1 %v1827_v1 }
 0x535   :  { %920 = vmatpush1.bf16.msra.mxu0 %v1830_v2  ;;  %961 = vmatpush1.bf16.msra.mxu1 %v1838_v6 }
 0x536   :  { %921 = vmatprep.subr.bf16.mxu0 %v1835_v5  ;;  %962 = vmatprep.subr.bf16.mxu1 %v1840_v9 }
 0x539   :  { %922 = vmatpush1.bf16.msra.mxu0 %v1844_v10  ;;  %963 = vmatpush1.bf16.msra.mxu1 %v1850_v14 }
 0x53a   :  { %923 = vmatprep.subr.bf16.mxu0 %v1847_v13  ;;  %964 = vmatprep.subr.bf16.mxu1 %v1852_v17 }
 0x53d   :  { %924 = vmatpush1.bf16.msra.mxu0 %v1856_v18  ;;  %965 = vmatpush1.bf16.msra.mxu1 %v1862_v22 }
 0x53e   :  { %925 = vmatprep.subr.bf16.mxu0 %v1859_v21  ;;  %966 = vmatprep.subr.bf16.mxu1 %v1864_v29 }
 0x541   :  { %926 = vmatpush1.bf16.msra.mxu0 %v1868_v32  ;;  %967 = vmatpush1.bf16.msra.mxu1 %v1872_v0 }
 0x542   :  { %1021 = vmatprep.subr.bf16.mxu0 %v1780_v37  ;;  %1062 = vmatprep.subr.bf16.mxu1 %v1787_v40 }
 0x5f7   :  { %v835_v15 = vpop.f32.mrb[32].mxu0  ;;  %v876_v23 = vpop.f32.mrb[32].mxu1 }
 0x5f8   :  { %v883_v33 = vadd.f32 %v835_v15, %v2240_v8  ;;  %v837_v63 = vpop.f32.mrb[33].mxu0  ;;  %v878_v4 = vpop.f32.mrb[33].mxu1  ;;  %v885_v50 = vadd.f32 %v876_v23, %v2242_v62 }
 0x5f9   :  { %v884_v7 = vadd.f32 %v837_v63, %v2241_v38  ;;  %v839_v11 = vpop.f32.mrb[34].mxu0  ;;  %v880_v42 = vpop.f32.mrb[34].mxu1  ;;  %v886_v39 = vadd.f32 %v878_v4, %v2243_v54  ;;  %v2245_v4 = vld [vmem:[#allocation22_spill] sm:$0xff] }
 0x5fa   :  { %v887_v35 = vmul.f32 0.5, %v883_v33  ;;  %v840_v3 = vpop.f32.mrb[35].mxu0  ;;  %v881_v46 = vpop.f32.mrb[35].mxu1 }
 0x5fb   :  { %v891_v55 = vmul.f32 0.5, %v884_v7  ;;  %v896_v59 = vmul.f32 0.5, %v886_v39 }
 0x5fc   :  { %1491 = vtanh.f32 %v887_v35 }
 0x5fd   :  { %1493 = vtanh.f32 %v891_v55  ;;  %v2246_v55 = vld [vmem:[#allocation21_spill] sm:$0xff] }
 0x5fe   :  { %1495 = vtanh.f32 %v885_v50 }
 0x5ff   :  { %1497 = vtanh.f32 %v896_v59 }
 0x606   :  { %v1492_v58 = vpop.eup %1491 }
 0x607   :  { %v1494_v16 = vpop.eup %1493  ;;  %v889_v43 = vmul.f32 0.5, %v1492_v58 }
 0x608   :  { %v893_v47 = vmul.f32 0.5, %v1494_v16  ;;  %v1496_v51 = vpop.eup %1495 }
 0x609   :  { %v890_v20 = vadd.f32 0.5, %v889_v43  ;;  %v1498_v19 = vpop.eup %1497 }
 0x60a   :  { %v894_v30 = vadd.f32 0.5, %v893_v47  ;;  %v898_v15 = vmul.f32 0.5, %v1498_v19 }
 0x60b   :  { %v901_v28 = vmul.f32 %v1496_v51, %v890_v20 }
 0x60c   :  { %v900_v12 = vmul.f32 %v894_v30, %v2044_v31  ;;  %v899_v23 = vadd.f32 0.5, %v898_v15 }
 0x60e   :  { %v2086_v34 = vadd.f32 %v901_v28, %v900_v12 }
 0x610   :  { %1499 = vtanh.f32 %v2086_v34 }
 0x61a   :  { %v1500_v8 = vpop.eup %1499 }
 0x61b   :  { %v904_v33 = vmul.f32 %v1500_v8, %v899_v23 }
 0x61d   :  { %v910_v63 = vpack.c.bf16 %v904_v33, %v904_v33  ;;  %v1531_v33 = vld [vmem:[#allocation2] sm:$0xff] }
 0x61f   :  { %944 = vmatmul.mubr.bf16.vlgmr.msra.gmra.mrb[36].mxu0 %v910_v63  ;;  %985 = vmatmul.mubr.bf16.vlgmr.msra.gmra.mrb[36].mxu1 %v910_v63  ;;  %v1532_v63 = vld [vmem:[#allocation2 + $0x10] sm:$0xff] }
 0x620   :  { %1022 = vmatpush1.bf16.msra.mxu0 %v1782_v24  ;;  %1063 = vmatpush1.bf16.msra.mxu1 %v1789_v26  ;;  %v2244_v26 = vld [vmem:[#allocation20_spill] sm:$0xff] }
 0x621   :  { %1023 = vmatprep.subr.bf16.mxu0 %v1784_v25  ;;  %1064 = vmatprep.subr.bf16.mxu1 %v1793_v27 }
 0x622   :  { %1053 = vmatprep.mubr.bf16.mxu0 %v2237_v36  ;;  %1094 = vmatprep.mubr.bf16.mxu1 %v2237_v36 }
 0x624   :  { %1024 = vmatpush1.bf16.msra.mxu0 %v1796_v41  ;;  %1065 = vmatpush1.bf16.msra.mxu1 %v1802_v45 }
 0x625   :  { %1025 = vmatprep.subr.bf16.mxu0 %v1799_v44  ;;  %1066 = vmatprep.subr.bf16.mxu1 %v1804_v48 }
 0x628   :  { %1026 = vmatpush1.bf16.msra.mxu0 %v1808_v49  ;;  %1067 = vmatpush1.bf16.msra.mxu1 %v1814_v53 }
 0x629   :  { %1027 = vmatprep.subr.bf16.mxu0 %v1811_v52  ;;  %1068 = vmatprep.subr.bf16.mxu1 %v1818_v57 }
 0x62c   :  { %1028 = vmatpush1.bf16.msra.mxu0 %v1816_v56  ;;  %1069 = vmatpush1.bf16.msra.mxu1 %v1823_v61 }
 0x62d   :  { %1029 = vmatprep.subr.bf16.mxu0 %v1821_v60  ;;  %1070 = vmatprep.subr.bf16.mxu1 %v1827_v1 }
 0x630   :  { %1030 = vmatpush1.bf16.msra.mxu0 %v1830_v2  ;;  %1071 = vmatpush1.bf16.msra.mxu1 %v1838_v6 }
 0x631   :  { %1031 = vmatprep.subr.bf16.mxu0 %v1835_v5  ;;  %1072 = vmatprep.subr.bf16.mxu1 %v1840_v9 }
 0x634   :  { %1032 = vmatpush1.bf16.msra.mxu0 %v1844_v10  ;;  %1073 = vmatpush1.bf16.msra.mxu1 %v1850_v14 }
 0x635   :  { %1033 = vmatprep.subr.bf16.mxu0 %v1847_v13  ;;  %1074 = vmatprep.subr.bf16.mxu1 %v1852_v17 }
 0x638   :  { %1034 = vmatpush1.bf16.msra.mxu0 %v1856_v18  ;;  %1075 = vmatpush1.bf16.msra.mxu1 %v1862_v22 }
 0x639   :  { %1035 = vmatprep.subr.bf16.mxu0 %v1859_v21  ;;  %1076 = vmatprep.subr.bf16.mxu1 %v1864_v29 }
 0x63c   :  { %1036 = vmatpush1.bf16.msra.mxu0 %v1868_v32  ;;  %1077 = vmatpush1.bf16.msra.mxu1 %v1872_v0 }
 0x63d   :  { %1131 = vmatprep.subr.bf16.mxu0 %v1780_v37  ;;  %1172 = vmatprep.subr.bf16.mxu1 %v1787_v40  ;;  %v2247_v37 = vld [vmem:[#allocation23_spill] sm:$0xff] }
 0x6f2   :  { %v945_v24 = vpop.f32.mrb[36].mxu0  ;;  %v986_v25 = vpop.f32.mrb[36].mxu1 }
 0x6f3   :  { %v993_v41 = vadd.f32 %v945_v24, %v2244_v26  ;;  %v947_v44 = vpop.f32.mrb[37].mxu0  ;;  %v988_v31 = vpop.f32.mrb[37].mxu1  ;;  %v995_v62 = vadd.f32 %v986_v25, %v2246_v55  ;;  %v1533_v24 = vld [vmem:[#allocation2 + $0x28] sm:$0xff]  ;;  %v1445_v55 = vld [vmem:[%s2214_s4 + $0x10] sm:$0xff]  }
 0x6f4   :  { %v994_v38 = vadd.f32 %v947_v44, %v2245_v4  ;;  %v949_v7 = vpop.f32.mrb[38].mxu0  ;;  %v990_v11 = vpop.f32.mrb[38].mxu1  ;;  %v996_v40 = vadd.f32 %v988_v31, %v2247_v37  ;;  %v1535_v25 = vld [vmem:[#allocation2 + $0x48] sm:$0xff]  ;;  %v1447_v37 = vld [vmem:[%s2214_s4 + $0x20] sm:$0xff]  }
 0x6f5   :  { %v997_v42 = vmul.f32 0.5, %v993_v41  ;;  %v950_v35 = vpop.f32.mrb[39].mxu0  ;;  %v991_v3 = vpop.f32.mrb[39].mxu1 }
 0x6f6   :  { %v1001_v46 = vmul.f32 0.5, %v994_v38  ;;  %v1006_v50 = vmul.f32 0.5, %v996_v40  ;;  %v1443_v35 = vld [vmem:[%s2214_s4] sm:$0xff]   ;;  %v1598_v3 = vmov 0.0   ;;  %v1448_v40 = vld [vmem:[%s2214_s4 + $0x28] sm:$0xff]  }
 0x6f7   :  { %1501 = vtanh.f32 %v997_v42 }
 0x6f8   :  { %1503 = vtanh.f32 %v1001_v46  ;;  %v1444_v46 = vld [vmem:[%s2214_s4 + $0x8] sm:$0xff]  }
 0x6f9   :  { %1505 = vtanh.f32 %v995_v62  ;;  %v1446_v62 = vld [vmem:[%s2214_s4 + $0x18] sm:$0xff]  }
 0x6fa   :  { %1507 = vtanh.f32 %v1006_v50  ;;  %v1449_v50 = vld [vmem:[%s2214_s4 + $0x30] sm:$0xff]  }
 0x701   :  { %v1502_v54 = vpop.eup %1501 }
 0x702   :  { %v1504_v39 = vpop.eup %1503  ;;  %v999_v59 = vmul.f32 0.5, %v1502_v54  ;;  %v1450_v54 = vld [vmem:[%s2214_s4 + $0x38] sm:$0xff]  }
 0x703   :  { %v1003_v58 = vmul.f32 0.5, %v1504_v39  ;;  %v1506_v43 = vpop.eup %1505 }
 0x704   :  { %v1000_v16 = vadd.f32 0.5, %v999_v59  ;;  %v1508_v28 = vpop.eup %1507 }
 0x705   :  { %v1004_v47 = vadd.f32 0.5, %v1003_v58  ;;  %v1008_v12 = vmul.f32 0.5, %v1508_v28  ;;  %v2252_v58 = vld [vmem:[#allocation28_spill] sm:$0xff] }
 0x706   :  { %v1011_v20 = vmul.f32 %v1506_v43, %v1000_v16 }
 0x707   :  { %v1010_v51 = vmul.f32 %v1004_v47, %v2086_v34  ;;  %v1009_v19 = vadd.f32 0.5, %v1008_v12  ;;  %v1534_v34 = vld [vmem:[#allocation2 + $0x20] sm:$0xff] }
 0x709   :  { %v2128_v30 = vadd.f32 %v1011_v20, %v1010_v51  ;;  %v2253_v20 = vld [vmem:[#allocation30_spill] sm:$0xff] }
 0x70b   :  { %1509 = vtanh.f32 %v2128_v30 }
 0x715   :  { %v1510_v15 = vpop.eup %1509 }
 0x716   :  { %v1014_v23 = vmul.f32 %v1510_v15, %v1009_v19 }
 0x718   :  { %v1020_v8 = vpack.c.bf16 %v1014_v23, %v1014_v23 }
 0x71a   :  { %1054 = vmatmul.mubr.bf16.vlgmr.msra.gmra.mrb[40].mxu0 %v1020_v8  ;;  %1095 = vmatmul.mubr.bf16.vlgmr.msra.gmra.mrb[40].mxu1 %v1020_v8  ;;  %v2254_v8 = vld [vmem:[#allocation29_spill] sm:$0xff] }
 0x71b   :  { %1132 = vmatpush1.bf16.msra.mxu0 %v1531_v33  ;;  %1173 = vmatpush1.bf16.msra.mxu1 %v1532_v63  ;;  %v2255_v63 = vld [vmem:[#allocation31_spill] sm:$0xff] }
 0x71c   :  { %1133 = vmatprep.subr.bf16.mxu0 %v1533_v24  ;;  %1174 = vmatprep.subr.bf16.mxu1 %v1793_v27 }
 0x71d   :  { %1163 = vmatprep.mubr.bf16.mxu0 %v2237_v36  ;;  %1204 = vmatprep.mubr.bf16.mxu1 %v2237_v36 }
 0x71f   :  { %1134 = vmatpush1.bf16.msra.mxu0 %v1534_v34  ;;  %1175 = vmatpush1.bf16.msra.mxu1 %v1802_v45  ;;  %v2248_v45 = vld [vmem:[#allocation24_spill] sm:$0xff] }
 0x720   :  { %1135 = vmatprep.subr.bf16.mxu0 %v1535_v25  ;;  %1176 = vmatprep.subr.bf16.mxu1 %v1804_v48 }
 0x723   :  { %1136 = vmatpush1.bf16.msra.mxu0 %v1808_v49  ;;  %1177 = vmatpush1.bf16.msra.mxu1 %v1814_v53  ;;  %v2249_v53 = vld [vmem:[#allocation26_spill] sm:$0xff] }
 0x724   :  { %1137 = vmatprep.subr.bf16.mxu0 %v1811_v52  ;;  %1178 = vmatprep.subr.bf16.mxu1 %v1818_v57 }
 0x727   :  { %1138 = vmatpush1.bf16.msra.mxu0 %v1816_v56  ;;  %1179 = vmatpush1.bf16.msra.mxu1 %v1823_v61 }
 0x728   :  { %1139 = vmatprep.subr.bf16.mxu0 %v1821_v60  ;;  %1180 = vmatprep.subr.bf16.mxu1 %v1827_v1 }
 0x72b   :  { %1140 = vmatpush1.bf16.msra.mxu0 %v1830_v2  ;;  %1181 = vmatpush1.bf16.msra.mxu1 %v1838_v6  ;;  %v2250_v6 = vld [vmem:[#allocation25_spill] sm:$0xff] }
 0x72c   :  { %1141 = vmatprep.subr.bf16.mxu0 %v1835_v5  ;;  %1182 = vmatprep.subr.bf16.mxu1 %v1840_v9 }
 0x72f   :  { %1142 = vmatpush1.bf16.msra.mxu0 %v1844_v10  ;;  %1183 = vmatpush1.bf16.msra.mxu1 %v1850_v14 }
 0x730   :  { %1143 = vmatprep.subr.bf16.mxu0 %v1847_v13  ;;  %1184 = vmatprep.subr.bf16.mxu1 %v1852_v17 }
 0x733   :  { %1144 = vmatpush1.bf16.msra.mxu0 %v1856_v18  ;;  %1185 = vmatpush1.bf16.msra.mxu1 %v1862_v22 }
 0x734   :  { %1145 = vmatprep.subr.bf16.mxu0 %v1859_v21  ;;  %1186 = vmatprep.subr.bf16.mxu1 %v1864_v29 }
 0x737   :  { %1146 = vmatpush1.bf16.msra.mxu0 %v1868_v32  ;;  %1187 = vmatpush1.bf16.msra.mxu1 %v1872_v0  ;;  %v2251_v0 = vld [vmem:[#allocation27_spill] sm:$0xff] }
 0x738   :  { %1402 = vmatprep.subr.bf16.mxu0 %v1598_v3 }
 0x7ed   :  { %v1055_v36 = vpop.f32.mrb[40].mxu0  ;;  %v1096_v27 = vpop.f32.mrb[40].mxu1 }
 0x7ee   :  { %v1103_v48 = vadd.f32 %v1055_v36, %v2248_v45  ;;  %v1057_v49 = vpop.f32.mrb[41].mxu0  ;;  %v1098_v52 = vpop.f32.mrb[41].mxu1  ;;  %v1105_v9 = vadd.f32 %v1096_v27, %v2250_v6 }
 0x7ef   :  { %v1104_v56 = vadd.f32 %v1057_v49, %v2249_v53  ;;  %v1059_v57 = vpop.f32.mrb[42].mxu0  ;;  %v1100_v60 = vpop.f32.mrb[42].mxu1  ;;  %v1106_v10 = vadd.f32 %v1098_v52, %v2251_v0 }
 0x7f0   :  { %v1107_v61 = vmul.f32 0.5, %v1103_v48  ;;  %v1060_v1 = vpop.f32.mrb[43].mxu0  ;;  %v1101_v2 = vpop.f32.mrb[43].mxu1 }
 0x7f1   :  { %v1111_v5 = vmul.f32 0.5, %v1104_v56  ;;  %v1116_v13 = vmul.f32 0.5, %v1106_v10 }
 0x7f2   :  { %1511 = vtanh.f32 %v1107_v61 }
 0x7f3   :  { %1513 = vtanh.f32 %v1111_v5 }
 0x7f4   :  { %1515 = vtanh.f32 %v1105_v9  ;;  %v1383_v9 = vld [vmem:[%s2215_s5] ss:$0 sm:$0xff] }
 0x7f5   :  { %1517 = vtanh.f32 %v1116_v13 }
 0x7fc   :  { %v1512_v14 = vpop.eup %1511 }
 0x7fd   :  { %v1514_v17 = vpop.eup %1513  ;;  %v1109_v18 = vmul.f32 0.5, %v1512_v14 }
 0x7fe   :  { %v1113_v21 = vmul.f32 0.5, %v1514_v17  ;;  %v1516_v29 = vpop.eup %1515 }
 0x7ff   :  { %v1110_v22 = vadd.f32 0.5, %v1109_v18  ;;  %v1518_v31 = vpop.eup %1517 }
 0x800   :  { %v1114_v32 = vadd.f32 0.5, %v1113_v21  ;;  %v1118_v4 = vmul.f32 0.5, %v1518_v31 }
 0x801   :  { %v1121_v26 = vmul.f32 %v1516_v29, %v1110_v22 }
 0x802   :  { %v1120_v41 = vmul.f32 %v1114_v32, %v2128_v30  ;;  %v1119_v38 = vadd.f32 0.5, %v1118_v4 }
 0x804   :  { %v2163_v44 = vadd.f32 %v1121_v26, %v1120_v41 }
 0x806   :  { %1519 = vtanh.f32 %v2163_v44 }
 0x810   :  { %v1520_v7 = vpop.eup %1519 }
 0x811   :  { %v1124_v11 = vmul.f32 %v1520_v7, %v1119_v38 }
 0x813   :  { %v1130_v42 = vpack.c.bf16 %v1124_v11, %v1124_v11 }
 0x815   :  { %1164 = vmatmul.mubr.bf16.vlgmr.msra.gmra.mrb[44].mxu0 %v1130_v42  ;;  %1205 = vmatmul.mubr.bf16.vlgmr.msra.gmra.mrb[44].mxu1 %v1130_v42 }
 0x816   :  { %1403 = vmatpush3.bf16.msra.mxu0 %v1443_v35  ;;  %1418 = vmatprep.mubr.msk.bf16.mxu0 %vm1599_vm1, %v1598_v3 }
 0x817   :  { %1404 = vmatprep.subr.bf16.mxu0 %v1598_v3 }
 0x81a   :  { %1405 = vmatpush3.bf16.msra.mxu0 %v1444_v46 }
 0x81b   :  { %1406 = vmatprep.subr.bf16.mxu0 %v1598_v3 }
 0x81e   :  { %1407 = vmatpush3.bf16.msra.mxu0 %v1445_v55 }
 0x81f   :  { %1408 = vmatprep.subr.bf16.mxu0 %v1598_v3 }
 0x822   :  { %1409 = vmatpush3.bf16.msra.mxu0 %v1446_v62 }
 0x823   :  { %1410 = vmatprep.subr.bf16.mxu0 %v1598_v3 }
 0x826   :  { %1411 = vmatpush3.bf16.msra.mxu0 %v1447_v37 }
 0x827   :  { %1412 = vmatprep.subr.bf16.mxu0 %v1598_v3 }
 0x82a   :  { %1413 = vmatpush3.bf16.msra.mxu0 %v1448_v40 }
 0x82b   :  { %1414 = vmatprep.subr.bf16.mxu0 %v1598_v3 }
 0x82e   :  { %1415 = vmatpush3.bf16.msra.mxu0 %v1449_v50 }
 0x82f   :  { %1416 = vmatprep.subr.bf16.mxu0 %v1598_v3 }
 0x832   :  { %1417 = vmatpush3.bf16.msra.mxu0 %v1450_v54 }
 0x8e8   :  { %v1165_v39 = vpop.f32.mrb[44].mxu0  ;;  %v1206_v59 = vpop.f32.mrb[44].mxu1 }
 0x8e9   :  { %v1213_v16 = vadd.f32 %v1165_v39, %v2252_v58  ;;  %v1167_v43 = vpop.f32.mrb[45].mxu0  ;;  %v1208_v47 = vpop.f32.mrb[45].mxu1  ;;  %v1215_v33 = vadd.f32 %v1206_v59, %v2254_v8 }
 0x8ea   :  { %v1214_v51 = vadd.f32 %v1167_v43, %v2253_v20  ;;  %v1169_v30 = vpop.f32.mrb[46].mxu0  ;;  %v1210_v28 = vpop.f32.mrb[46].mxu1  ;;  %v1216_v24 = vadd.f32 %v1208_v47, %v2255_v63 }
 0x8eb   :  { %v1217_v12 = vmul.f32 0.5, %v1213_v16  ;;  %v1170_v19 = vpop.f32.mrb[47].mxu0  ;;  %v1211_v15 = vpop.f32.mrb[47].mxu1 }
 0x8ec   :  { %v1221_v23 = vmul.f32 0.5, %v1214_v51  ;;  %v1226_v34 = vmul.f32 0.5, %v1216_v24 }
 0x8ed   :  { %1521 = vtanh.f32 %v1217_v12 }
 0x8ee   :  { %1523 = vtanh.f32 %v1221_v23 }
 0x8ef   :  { %1525 = vtanh.f32 %v1215_v33 }
 0x8f0   :  { %1527 = vtanh.f32 %v1226_v34 }
 0x8f7   :  { %v1522_v25 = vpop.eup %1521 }
 0x8f8   :  { %v1524_v36 = vpop.eup %1523  ;;  %v1219_v27 = vmul.f32 0.5, %v1522_v25 }
 0x8f9   :  { %v1223_v45 = vmul.f32 0.5, %v1524_v36  ;;  %v1526_v49 = vpop.eup %1525 }
 0x8fa   :  { %v1220_v48 = vadd.f32 0.5, %v1219_v27  ;;  %v1528_v60 = vpop.eup %1527 }
 0x8fb   :  { %v1224_v52 = vadd.f32 0.5, %v1223_v45  ;;  %v1228_v61 = vmul.f32 0.5, %v1528_v60 }
 0x8fc   :  { %v1231_v53 = vmul.f32 %v1526_v49, %v1220_v48 }
 0x8fd   :  { %v1230_v56 = vmul.f32 %v1224_v52, %v2163_v44  ;;  %v1229_v1 = vadd.f32 0.5, %v1228_v61 }
 0x8ff   :  { %v1232_v57 = vadd.f32 %v1231_v53, %v1230_v56 }
 0x901   :  { %1529 = vtanh.f32 %v1232_v57 }
 0x90b   :  { %v1530_v2 = vpop.eup %1529 }
 0x90c   :  { %v1234_v5 = vmul.f32 %v1530_v2, %v1229_v1 }
 0x90e   :  { %v1235_v6 = vpack.c.bf16 %v1234_v5, %v1234_v5 }
 0x910   :  { %1419 = vmatmul.mubr.bf16.vlgmr.msra.gmra.mrb[48].mxu0 %v1235_v6 }
 0x9e3   :  { %v1341_v0 = vpop.f32.mrb[48].mxu0 }
 0x9e4   :  { %v1342_v10 = vadd.f32 %v1383_v9, %v1341_v0  ;;  %v1420_v13 = vpop.f32.mrb[49].mxu0 }
 0x9e5   :  { %v1344_v14 = vpop.f32.mrb[50].mxu0 }
 0x9e6   :  { %1347 = vst [vmem:[#allocation8] sm:$0xff] %v1342_v10  ;;  %v1421_v17 = vpop.f32.mrb[51].mxu0 }
 0x9e7   :  { %1569 = shalt.err (!%p1566_p12)
}
 0x9e8   :  { %s1570_s5 = scalar_lea.hbm %s2216_s6, 128 }
 0x9e9   :  { %p1571_p13 = scmp.ne.s32.totalorder %s2216_s6, %s1570_s5  ;;  %p1574_p0 = scmp.lt.u32.totalorder %s1570_s5, %s2216_s6 }
 0x9eb   :  { %p1576_p1 = pnand %p1574_p0, %p1571_p13 }
 0x9ed   :  { %1579 = shalt.err (!%p1576_p1)
}
 0x9ee   :  { %1357 = dma.vmem_to_hbm [thread:$0]  %s1355_s7, 128, %s2216_s6, [#allocation7]  }
 0x9ef   :  { %1584 = dma.done.wait [#allocation7], 128  }
 0x9f0   :  { %1585 = vsyncadd [#allocation7], 4294967168 }
 0x9f1   :  { %1361 = vsyncpa [#allocation6], 1 }
 0x9f2   :  { %1362 = vsyncpa [#allocation7], 1 }
 0x9f3   :  { %1363 = vsyncmov [#allocation4] }
 0x9f6   :  { %s1364_s0 = vpop.sfrf %1363 }
 0x9f7   :  { %p1392_p2 = scmp.ne.s32.totalorder %s1364_s0, 0 }
 0x9f9   :  { %1368 = shalt.err (%p1392_p2)  }

</bundles_post_ra>
